<compile_context>
chip_gen: v5e
topology: v5e:2x2
jax: 0.10.0
libtpu: 0.0.40
codegen_flags: <defaults>
</compile_context>

<pallas_src>
import functools

import jax
import jax.numpy as jnp
from jax.experimental import pallas as pl
from jax.experimental.pallas import tpu as pltpu

IN_LATENT = 64
H1, H2, H3 = 128, 256, 512
IMG = 1 * 28 * 28          # 784 = 6*128 + 16 -> 6 unmasked vregs + 1 masked tail
TILE_B_MAX = 512           # ~8-10 MB VMEM at 512 rows; far under every gen's limit


def _round_up(n, m):
    return ((n + m - 1) // m) * m


def _cdiv(n, m):
    return (n + m - 1) // m


def _pick_tiling(B):
    """Balanced batch tiles with minimal padding; >=2 (even) grid steps for v7x."""
    num_tiles = max(1, _cdiv(B, TILE_B_MAX))
    if B >= 16:
        # Ensure the ("parallel",) batch grid can shard across v7x's 2 TCs.
        num_tiles = max(num_tiles, 2)
        if num_tiles % 2:
            num_tiles += 1
    tile_b = _round_up(_cdiv(B, num_tiles), 8)
    b_pad = _round_up(B, tile_b)
    return tile_b, b_pad, b_pad // tile_b


def _resident_spec(shape):
    """Constant-index_map operand: VMEM-resident; single-buffered when supported."""
    index_map = lambda i: (0,) * len(shape)
    try:
        return pl.BlockSpec(shape, index_map, pipeline_mode=pl.Buffered(1))
    except TypeError:  # older jax without the pipeline_mode kwarg
        return pl.BlockSpec(shape, index_map)


def _decoder_kernel(x_ref, w1_ref, b1_ref, w2_ref, b2_ref, w3_ref, w4_ref, o_ref):
    # x tile: (tile_b, 64) f32; weights: bf16, DMA'd once and VMEM-resident.
    x = x_ref[...].astype(jnp.bfloat16)

    # dec_3: Linear(64 -> 128) + ReLU   (K=64 underfills MXU but is <2% of FLOPs)
    h = jnp.dot(x, w1_ref[...], preferred_element_type=jnp.float32) + b1_ref[...]
    h = jnp.maximum(h, 0.0)

    # new_dec1: Linear(128 -> 256) + ReLU
    h = jnp.dot(h.astype(jnp.bfloat16), w2_ref[...],
                preferred_element_type=jnp.float32) + b2_ref[...]
    h = jnp.maximum(h, 0.0)

    # new_dec2: Linear(256 -> 512, no bias) + ReLU
    h = jnp.dot(h.astype(jnp.bfloat16), w3_ref[...],
                preferred_element_type=jnp.float32)
    h = jnp.maximum(h, 0.0)

    # dec_4: Linear(512 -> 784, no bias) + sigmoid.
    logits = jnp.dot(h.astype(jnp.bfloat16), w4_ref[...],
                     preferred_element_type=jnp.float32)
    # sigmoid = 1 / (1 + exp(-z)): exp on the EUP, divide via EUP approx
    # reciprocal (keeps it off the VALU); well within bf16-level tolerance.
    sig = pl.reciprocal(1.0 + jnp.exp(-logits), approx=True)
    o_ref[...] = sig.astype(o_ref.dtype)


@functools.partial(jax.jit, static_argnames=("out_dtype",))
def decoder_forward(x, params, out_dtype=jnp.float32):
    """x: (B, 64) float32  ->  (B, 1, 28, 28) out_dtype (default f32)."""
    w1, b1, w2, b2, w3, w4 = params
    B = x.shape[0]

    tile_b, b_pad, num_tiles = _pick_tiling(B)
    if b_pad != B:
        x = jnp.pad(x, ((0, b_pad - B), (0, 0)))
    grid = (num_tiles,)

    out_bytes = jnp.dtype(out_dtype).itemsize
    flops = 2 * b_pad * (IN_LATENT * H1 + H1 * H2 + H2 * H3 + H3 * IMG)
    bytes_accessed = (
        b_pad * IN_LATENT * 4                                    # x (f32)
        + (IN_LATENT * H1 + H1 * H2 + H2 * H3 + H3 * IMG) * 2    # weights (bf16)
        + (H1 + H2) * 4                                          # biases (f32)
        + b_pad * IMG * out_bytes                                # out
    )

    flat = pl.pallas_call(
        _decoder_kernel,
        out_shape=jax.ShapeDtypeStruct((b_pad, IMG), out_dtype),
        grid=grid,
        in_specs=[
            pl.BlockSpec((tile_b, IN_LATENT), lambda i: (i, 0)),   # x tile
            _resident_spec((IN_LATENT, H1)),                       # w1 (resident)
            _resident_spec((1, H1)),                               # b1
            _resident_spec((H1, H2)),                              # w2
            _resident_spec((1, H2)),                               # b2
            _resident_spec((H2, H3)),                              # w3
            _resident_spec((H3, IMG)),                             # w4
        ],
        # Last block dim == full array dim (784): legal, and no column padding
        # means no wrapper-side slice / extra HBM round-trip of the output.
        out_specs=pl.BlockSpec((tile_b, IMG), lambda i: (i, 0)),
        compiler_params=pltpu.CompilerParams(
            dimension_semantics=("parallel",),       # batch grid -> both TCs on v7x
            vmem_limit_bytes=32 * 1024 * 1024,       # raise v5e's 16 MiB default
        ),
        cost_estimate=pl.CostEstimate(
            flops=flops,
            transcendentals=2 * b_pad * IMG,         # exp + approx reciprocal
            bytes_accessed=bytes_accessed,
        ),
    )(x, w1, b1, w2, b2, w3, w4)

    # Only row padding (if any) to drop; reshape to NCHW like PyTorch is free.
    if b_pad != B:
        flat = flat[:B]
    return flat.reshape(B, 1, 28, 28)


def init_params(key):
    """Deterministic init mimicking torch.nn.Linear default (U(-1/sqrt(in), 1/sqrt(in))).
    Weights stored as (in_features, out_features); weights bf16, biases f32."""
    k1, k2, k3, k4, k5, k6 = jax.random.split(key, 6)

    def unif(k, shape, fan_in):
        bound = 1.0 / jnp.sqrt(jnp.float32(fan_in))
        return jax.random.uniform(k, shape, jnp.float32, -bound, bound)

    w1 = unif(k1, (IN_LATENT, H1), IN_LATENT).astype(jnp.bfloat16)
    b1 = unif(k2, (1, H1), IN_LATENT)
    w2 = unif(k3, (H1, H2), H1).astype(jnp.bfloat16)
    b2 = unif(k4, (1, H2), H1)
    w3 = unif(k5, (H2, H3), H2).astype(jnp.bfloat16)   # no bias
    w4 = unif(k6, (H3, IMG), H3).astype(jnp.bfloat16)  # no bias
    return (w1, b1, w2, b2, w3, w4)


def decoder_reference(x, params):
    """Pure-JAX f32 reference (same bf16-rounded weight values, f32 math)."""
    w1, b1, w2, b2, w3, w4 = params
    w1, w2, w3, w4 = (w.astype(jnp.float32) for w in (w1, w2, w3, w4))
    h = jax.nn.relu(x @ w1 + b1)
    h = jax.nn.relu(h @ w2 + b2)
    h = jax.nn.relu(h @ w3)
    out = jax.nn.sigmoid(h @ w4)
    return out.reshape(x.shape[0], 1, 28, 28)


if __name__ == "__main__":
    key = jax.random.PRNGKey(0)
    k_params, k_x = jax.random.split(key)
    params = init_params(k_params)

    # B=8: single-tile path; B=19: padded batch + 2-step grid (multi-TC path).
    for B in (8, 19):
        kx = jax.random.fold_in(k_x, B)
        x = jax.random.normal(kx, (B, IN_LATENT), jnp.float32)

        out = jax.block_until_ready(decoder_forward(x, params))
        ref = decoder_reference(x, params)

        assert out.shape == (B, 1, 28, 28), out.shape
        # bf16 weights + bf16 activations into the MXU -> loosened tolerance.
        assert jnp.allclose(out, ref, atol=2e-2, rtol=2e-2), "mismatch vs reference"
        assert bool(jnp.all(jnp.isfinite(out))), "non-finite output"

    print("KERNEL_OK")
</pallas_src>

<mosaic_0001>
module attributes {stable_mosaic.version = 11 : i64} {
  func.func @_decoder_kernel(%arg0: i32, %arg1: memref<8x64xf32, #tpu.memory_space<vmem>>, %arg2: memref<64x128xbf16, #tpu.memory_space<vmem>>, %arg3: memref<1x128xf32, #tpu.memory_space<vmem>>, %arg4: memref<128x256xbf16, #tpu.memory_space<vmem>>, %arg5: memref<1x256xf32, #tpu.memory_space<vmem>>, %arg6: memref<256x512xbf16, #tpu.memory_space<vmem>>, %arg7: memref<512x784xbf16, #tpu.memory_space<vmem>>, %arg8: memref<8x784xf32, #tpu.memory_space<vmem>>) attributes {dimension_semantics = [#tpu.dimension_semantics<parallel>], iteration_bounds = array<i64: 1>, scalar_prefetch = 0 : i64, scratch_operands = 0 : i64, tpu.core_type = #tpu.core_type<tc>, window_params = [{transform_indices = @transform_0, window_bounds = array<i64: 8, 64>}, {pipeline_mode = #tpu.pipeline_mode<synchronous>, transform_indices = @transform_1, window_bounds = array<i64: 64, 128>}, {pipeline_mode = #tpu.pipeline_mode<synchronous>, transform_indices = @transform_2, window_bounds = array<i64: 1, 128>}, {pipeline_mode = #tpu.pipeline_mode<synchronous>, transform_indices = @transform_3, window_bounds = array<i64: 128, 256>}, {pipeline_mode = #tpu.pipeline_mode<synchronous>, transform_indices = @transform_4, window_bounds = array<i64: 1, 256>}, {pipeline_mode = #tpu.pipeline_mode<synchronous>, transform_indices = @transform_5, window_bounds = array<i64: 256, 512>}, {pipeline_mode = #tpu.pipeline_mode<synchronous>, transform_indices = @transform_6, window_bounds = array<i64: 512, 784>}, {transform_indices = @transform_7, window_bounds = array<i64: 8, 784>}]} {
    %c0 = arith.constant 0 : index
    %c0_0 = arith.constant 0 : index
    %0 = vector.load %arg1[%c0, %c0_0] : memref<8x64xf32, #tpu.memory_space<vmem>>, vector<8x64xf32>
    %1 = arith.truncf %0 : vector<8x64xf32> to vector<8x64xbf16>
    %c0_1 = arith.constant 0 : index
    %c0_2 = arith.constant 0 : index
    %2 = vector.load %arg2[%c0_1, %c0_2] : memref<64x128xbf16, #tpu.memory_space<vmem>>, vector<64x128xbf16>
    %cst = arith.constant dense<0.000000e+00> : vector<8x128xf32>
    %3 = tpu.matmul %1, %2, %cst {dimension_numbers = #tpu.dot_dimension_numbers<[1], [0], [0], [1], [0, 0, 1, 1], [], []>} : vector<8x64xbf16>, vector<64x128xbf16>, vector<8x128xf32> -> vector<8x128xf32>
    %c0_3 = arith.constant 0 : index
    %c0_4 = arith.constant 0 : index
    %4 = vector.load %arg3[%c0_3, %c0_4] : memref<1x128xf32, #tpu.memory_space<vmem>>, vector<1x128xf32>
    %5 = vector.broadcast %4 : vector<1x128xf32> to vector<8x128xf32>
    %6 = arith.addf %3, %5 : vector<8x128xf32>
    %cst_5 = arith.constant 0.000000e+00 : f32
    %7 = vector.broadcast %cst_5 : f32 to vector<8x128xf32>
    %8 = arith.maximumf %6, %7 : vector<8x128xf32>
    %9 = arith.truncf %8 : vector<8x128xf32> to vector<8x128xbf16>
    %c0_6 = arith.constant 0 : index
    %c0_7 = arith.constant 0 : index
    %10 = vector.load %arg4[%c0_6, %c0_7] : memref<128x256xbf16, #tpu.memory_space<vmem>>, vector<128x256xbf16>
    %cst_8 = arith.constant dense<0.000000e+00> : vector<8x256xf32>
    %11 = tpu.matmul %9, %10, %cst_8 {dimension_numbers = #tpu.dot_dimension_numbers<[1], [0], [0], [1], [0, 0, 1, 1], [], []>} : vector<8x128xbf16>, vector<128x256xbf16>, vector<8x256xf32> -> vector<8x256xf32>
    %c0_9 = arith.constant 0 : index
    %c0_10 = arith.constant 0 : index
    %12 = vector.load %arg5[%c0_9, %c0_10] : memref<1x256xf32, #tpu.memory_space<vmem>>, vector<1x256xf32>
    %13 = vector.broadcast %12 : vector<1x256xf32> to vector<8x256xf32>
    %14 = arith.addf %11, %13 : vector<8x256xf32>
    %cst_11 = arith.constant 0.000000e+00 : f32
    %15 = vector.broadcast %cst_11 : f32 to vector<8x256xf32>
    %16 = arith.maximumf %14, %15 : vector<8x256xf32>
    %17 = arith.truncf %16 : vector<8x256xf32> to vector<8x256xbf16>
    %c0_12 = arith.constant 0 : index
    %c0_13 = arith.constant 0 : index
    %18 = vector.load %arg6[%c0_12, %c0_13] : memref<256x512xbf16, #tpu.memory_space<vmem>>, vector<256x512xbf16>
    %cst_14 = arith.constant dense<0.000000e+00> : vector<8x512xf32>
    %19 = tpu.matmul %17, %18, %cst_14 {dimension_numbers = #tpu.dot_dimension_numbers<[1], [0], [0], [1], [0, 0, 1, 1], [], []>} : vector<8x256xbf16>, vector<256x512xbf16>, vector<8x512xf32> -> vector<8x512xf32>
    %cst_15 = arith.constant 0.000000e+00 : f32
    %20 = vector.broadcast %cst_15 : f32 to vector<8x512xf32>
    %21 = arith.maximumf %19, %20 : vector<8x512xf32>
    %22 = arith.truncf %21 : vector<8x512xf32> to vector<8x512xbf16>
    %c0_16 = arith.constant 0 : index
    %c0_17 = arith.constant 0 : index
    %23 = vector.load %arg7[%c0_16, %c0_17] : memref<512x784xbf16, #tpu.memory_space<vmem>>, vector<512x784xbf16>
    %cst_18 = arith.constant dense<0.000000e+00> : vector<8x784xf32>
    %24 = tpu.matmul %22, %23, %cst_18 {dimension_numbers = #tpu.dot_dimension_numbers<[1], [0], [0], [1], [0, 0, 1, 1], [], []>} : vector<8x512xbf16>, vector<512x784xbf16>, vector<8x784xf32> -> vector<8x784xf32>
    %cst_19 = arith.constant 0.000000e+00 : f32
    %25 = vector.broadcast %cst_19 : f32 to vector<8x784xf32>
    %26 = arith.subf %25, %24 : vector<8x784xf32>
    %27 = math.exp %26 : vector<8x784xf32>
    %cst_20 = arith.constant 1.000000e+00 : f32
    %28 = vector.broadcast %cst_20 : f32 to vector<8x784xf32>
    %29 = arith.addf %28, %27 : vector<8x784xf32>
    %30 = tpu.reciprocal %29 {approx = true} : vector<8x784xf32> -> vector<8x784xf32>
    %c0_21 = arith.constant 0 : index
    %c0_22 = arith.constant 0 : index
    %31 = vector.load %arg8[%c0_21, %c0_22] : memref<8x784xf32, #tpu.memory_space<vmem>>, vector<8x784xf32>
    tpu.vector_store %arg8[%c0_21, %c0_22], %30 {strides = array<i32>} : memref<8x784xf32, #tpu.memory_space<vmem>>, vector<8x784xf32>,
    return
  }
  func.func @transform_0(%arg0: i32) -> (i32, i32) {
    %c0_i32 = arith.constant 0 : i32
    %c0_i32_0 = arith.constant 0 : i32
    return %arg0, %c0_i32 : i32, i32
  }
  func.func @transform_1(%arg0: i32) -> (i32, i32) {
    %c0_i32 = arith.constant 0 : i32
    %c0_i32_0 = arith.constant 0 : i32
    %c0_i32_1 = arith.constant 0 : i32
    return %c0_i32, %c0_i32_0 : i32, i32
  }
  func.func @transform_2(%arg0: i32) -> (i32, i32) {
    %c0_i32 = arith.constant 0 : i32
    %c0_i32_0 = arith.constant 0 : i32
    %c0_i32_1 = arith.constant 0 : i32
    return %c0_i32, %c0_i32_0 : i32, i32
  }
  func.func @transform_3(%arg0: i32) -> (i32, i32) {
    %c0_i32 = arith.constant 0 : i32
    %c0_i32_0 = arith.constant 0 : i32
    %c0_i32_1 = arith.constant 0 : i32
    return %c0_i32, %c0_i32_0 : i32, i32
  }
  func.func @transform_4(%arg0: i32) -> (i32, i32) {
    %c0_i32 = arith.constant 0 : i32
    %c0_i32_0 = arith.constant 0 : i32
    %c0_i32_1 = arith.constant 0 : i32
    return %c0_i32, %c0_i32_0 : i32, i32
  }
  func.func @transform_5(%arg0: i32) -> (i32, i32) {
    %c0_i32 = arith.constant 0 : i32
    %c0_i32_0 = arith.constant 0 : i32
    %c0_i32_1 = arith.constant 0 : i32
    return %c0_i32, %c0_i32_0 : i32, i32
  }
  func.func @transform_6(%arg0: i32) -> (i32, i32) {
    %c0_i32 = arith.constant 0 : i32
    %c0_i32_0 = arith.constant 0 : i32
    %c0_i32_1 = arith.constant 0 : i32
    return %c0_i32, %c0_i32_0 : i32, i32
  }
  func.func @transform_7(%arg0: i32) -> (i32, i32) {
    %c0_i32 = arith.constant 0 : i32
    %c0_i32_0 = arith.constant 0 : i32
    return %arg0, %c0_i32 : i32, i32
  }
}

</mosaic_0001>

<bundles_post_ra>
// kernel: decoder_forward.1
= control target key start
LH: loop header
LB: loop body
LE: loop exit
PB: predicated region body
PF: predicated region fallthrough
CT: control target
= control target key end

     0   :  { %vm65_vm0 = vcmask 523264   ;;  %vm2525_vm1 = vcmask 130048   ;;  %s6061_s1 = inlined_call_operand.vmem [shape: bf16[64,128], index: 1, kind: input, shape index: {}]   ;;  %s6062_s3 = inlined_call_operand.vmem [shape: bf16[128,256], index: 3, kind: input, shape index: {}]   ;;  %s6063_s0 = inlined_call_operand.vmem [shape: f32[8,64], index: 0, kind: input, shape index: {}]   ;;  %s6064_s2 = inlined_call_operand.vmem [shape: f32[1,128], index: 2, kind: input, shape index: {}]   ;;  %s6065_s5 = inlined_call_operand.vmem [shape: bf16[256,512], index: 5, kind: input, shape index: {}]   ;;  %s6066_s4 = inlined_call_operand.vmem [shape: f32[1,256], index: 4, kind: input, shape index: {}]   ;;  %s6067_s6 = inlined_call_operand.vmem [shape: bf16[512,784], index: 6, kind: input, shape index: {}]   ;;  %s6068_s7 = inlined_call_operand.vmem [shape: f32[8,784], index: 7, kind: output, shape index: {}]  }
   0x1   :  { %v3767_v0 = vld [vmem:[%s6061_s1 + $0x18] sm:$0xff]  ;;  %v3766_v1 = vld [vmem:[%s6061_s1 + $0x10] sm:$0xff]  ;;  %v2598_v8 = vld [vmem:[%s6062_s3 + $0x60] sm:$0xf] }
   0x2   :  { %v2606_v2 = vld [vmem:[%s6062_s3 + $0x70] sm:$0xf]  ;;  %73 = vmatpush.bf16.msra.mxu0 %v3767_v0  ;;  %v3783_v3 = vld [vmem:[%s6062_s3 + $0x74] sm:$0xf0]  ;;  %v3782_v4 = vld [vmem:[%s6062_s3 + $0x74] sm:$0xf] }
   0x3   :  { %v2608_v5 = vld [vmem:[%s6062_s3 + $0x78] sm:$0xf0]  ;;  %v2607_v6 = vor.u32 %v3783_v3, %v2606_v2  ;;  %v3781_v9 = vld [vmem:[%s6062_s3 + $0x64] sm:$0xf0]  ;;  %v3780_v10 = vld [vmem:[%s6062_s3 + $0x64] sm:$0xf] }
   0x4   :  { %v2611_v7 = vor.u32 %v3782_v4, %v2608_v5  ;;  %v2600_v11 = vld [vmem:[%s6062_s3 + $0x68] sm:$0xf0]  ;;  %v2599_v13 = vor.u32 %v3781_v9, %v2598_v8  ;;  %v2590_v15 = vld [vmem:[%s6062_s3 + $0x50] sm:$0xf]  ;;  %v3779_v16 = vld [vmem:[%s6062_s3 + $0x54] sm:$0xf0] }
   0x5   :  { %v3765_v12 = vld [vmem:[%s6061_s1 + $0x8] sm:$0xff]  ;;  %186 = vmatpush.bf16.msra.mxu1 %v2607_v6  ;;  %v2603_v14 = vor.u32 %v3780_v10, %v2600_v11  ;;  %v3778_v17 = vld [vmem:[%s6062_s3 + $0x54] sm:$0xf]  ;;  %v2592_v18 = vld [vmem:[%s6062_s3 + $0x58] sm:$0xf0]  ;;  %v2591_v20 = vor.u32 %v3779_v16, %v2590_v15 }
   0x6   :  { %199 = vmatpush.bf16.msra.mxu2 %v2611_v7  ;;  %74 = vmatpush.bf16.msra.mxu0 %v3766_v1  ;;  %v3764_v19 = vld [vmem:[%s6061_s1] sm:$0xff]  ;;  %v2595_v21 = vor.u32 %v3778_v17, %v2592_v18  ;;  %v3777_v24 = vld [vmem:[%s6062_s3 + $0x44] sm:$0xf0]  ;;  %v2584_v26 = vld [vmem:[%s6062_s3 + $0x48] sm:$0xf0] }
   0x7   :  { %v27_v22 = vld [vmem:[%s6063_s0] sm:$0xff]  ;;  %v2574_v30 = vld [vmem:[%s6062_s3 + $0x30] sm:$0xf]  ;;  %v3775_v31 = vld [vmem:[%s6062_s3 + $0x34] sm:$0xf0] }
   0x8   :  { %v2582_v23 = vld [vmem:[%s6062_s3 + $0x40] sm:$0xf]  ;;  %v3776_v25 = vld [vmem:[%s6062_s3 + $0x44] sm:$0xf]  ;;  %v28_v27 = vpack.c.bf16 %v27_v22, %v27_v22  ;;  %v3774_v32 = vld [vmem:[%s6062_s3 + $0x34] sm:$0xf]  ;;  %v2575_v34 = vor.u32 %v3775_v31, %v2574_v30 }
   0x9   :  { %187 = vmatpush.bf16.msra.mxu1 %v2599_v13  ;;  %v2583_v28 = vor.u32 %v3777_v24, %v2582_v23  ;;  %v2587_v29 = vor.u32 %v3776_v25, %v2584_v26  ;;  %v2576_v33 = vld [vmem:[%s6062_s3 + $0x38] sm:$0xf0]  ;;  %v2566_v36 = vld [vmem:[%s6062_s3 + $0x20] sm:$0xf]  ;;  %v3773_v37 = vld [vmem:[%s6062_s3 + $0x24] sm:$0xf0] }
   0xa   :  { %200 = vmatpush.bf16.msra.mxu2 %v2603_v14  ;;  %75 = vmatpush.bf16.msra.mxu0 %v3765_v12  ;;  %v2579_v35 = vor.u32 %v3774_v32, %v2576_v33  ;;  %v3772_v38 = vld [vmem:[%s6062_s3 + $0x24] sm:$0xf]  ;;  %v2568_v39 = vld [vmem:[%s6062_s3 + $0x28] sm:$0xf0]  ;;  %v2567_v40 = vor.u32 %v3773_v37, %v2566_v36  ;;  %v2558_v42 = vld [vmem:[%s6062_s3 + $0x10] sm:$0xf] }
   0xb   :  { %v2571_v41 = vor.u32 %v3772_v38, %v2568_v39  ;;  %v3771_v43 = vld [vmem:[%s6062_s3 + $0x14] sm:$0xf0]  ;;  %v3770_v44 = vld [vmem:[%s6062_s3 + $0x14] sm:$0xf]  ;;  %v2560_v46 = vld [vmem:[%s6062_s3 + $0x18] sm:$0xf0] }
   0xc   :  { %v2559_v45 = vor.u32 %v3771_v43, %v2558_v42  ;;  %v2563_v47 = vor.u32 %v3770_v44, %v2560_v46  ;;  %v2550_v48 = vld [vmem:[%s6062_s3] sm:$0xf]  ;;  %v3769_v49 = vld [vmem:[%s6062_s3 + $0x4] sm:$0xf0]  ;;  %v3768_v50 = vld [vmem:[%s6062_s3 + $0x4] sm:$0xf] }
   0xd   :  { %188 = vmatpush.bf16.msra.mxu1 %v2591_v20  ;;  %v2551_v51 = vor.u32 %v3769_v49, %v2550_v48  ;;  %v2552_v52 = vld [vmem:[%s6062_s3 + $0x8] sm:$0xf0]  ;;  %v2726_v54 = vld [vmem:[%s6065_s5 + $0xe0] sm:$0xf]  ;;  %v3814_v55 = vld [vmem:[%s6065_s5 + $0xec] sm:$0xf0] }
   0xe   :  { %201 = vmatpush.bf16.msra.mxu2 %v2595_v21  ;;  %76 = vmatpush.bf16.msra.mxu0 %v3764_v19  ;;  %v2555_v53 = vor.u32 %v3768_v50, %v2552_v52  ;;  %v3812_v56 = vld [vmem:[%s6065_s5 + $0xe4] sm:$0xf]  ;;  %v2727_v57 = vor.u32 %v3814_v55, %v2726_v54  ;;  %v2728_v58 = vld [vmem:[%s6065_s5 + $0xf0] sm:$0xf0]  ;;  %v2710_v59 = vld [vmem:[%s6065_s5 + $0xc0] sm:$0xf] }
   0xf   :  { %v3810_v60 = vld [vmem:[%s6065_s5 + $0xcc] sm:$0xf0]  ;;  %v2731_v61 = vor.u32 %v3812_v56, %v2728_v58  ;;  %v3808_v62 = vld [vmem:[%s6065_s5 + $0xc4] sm:$0xf]  ;;  %v2712_v63 = vld [vmem:[%s6065_s5 + $0xd0] sm:$0xf0] }
  0x10   :  { %v2854_v0 = vld [vmem:[%s6065_s5 + $0x1e0] sm:$0xf]  ;;  %600 = vmatpush.bf16.msra.mxu3 %v2727_v57  ;;  %v2711_v1 = vor.u32 %v3810_v60, %v2710_v59  ;;  %v3846_v2 = vld [vmem:[%s6065_s5 + $0x1ec] sm:$0xf0]  ;;  %v3844_v3 = vld [vmem:[%s6065_s5 + $0x1e4] sm:$0xf]  ;;  %v2715_v5 = vor.u32 %v3808_v62, %v2712_v63 }
  0x11   :  { %2547 = vmatmul.msk.bf16.vlgmr.msra.gmra.mxu0 %vm65_vm0, %v28_v27  ;;  %189 = vmatpush.bf16.msra.mxu1 %v2583_v28  ;;  %v2856_v4 = vld [vmem:[%s6065_s5 + $0x1f0] sm:$0xf0]  ;;  %v2855_v6 = vor.u32 %v3846_v2, %v2854_v0  ;;  %v2694_v8 = vld [vmem:[%s6065_s5 + $0xa0] sm:$0xf]  ;;  %v3806_v9 = vld [vmem:[%s6065_s5 + $0xac] sm:$0xf0] }
  0x12   :  { %202 = vmatpush.bf16.msra.mxu2 %v2587_v29  ;;  %v2859_v7 = vor.u32 %v3844_v3, %v2856_v4  ;;  %v3804_v10 = vld [vmem:[%s6065_s5 + $0xa4] sm:$0xf]  ;;  %v2696_v11 = vld [vmem:[%s6065_s5 + $0xb0] sm:$0xf0]  ;;  %v2838_v12 = vld [vmem:[%s6065_s5 + $0x1c0] sm:$0xf]  ;;  %v2695_v17 = vor.u32 %v3806_v9, %v2694_v8 }
  0x13   :  { %v3842_v13 = vld [vmem:[%s6065_s5 + $0x1cc] sm:$0xf0]  ;;  %613 = vmatpush.bf16.msrb.mxu0 %v2855_v6  ;;  %v3840_v15 = vld [vmem:[%s6065_s5 + $0x1c4] sm:$0xf]  ;;  %v2840_v16 = vld [vmem:[%s6065_s5 + $0x1d0] sm:$0xf0]  ;;  %v2699_v21 = vor.u32 %v3804_v10, %v2696_v11 }
  0x14   :  { %v2839_v14 = vor.u32 %v3842_v13, %v2838_v12  ;;  %601 = vmatpush.bf16.msra.mxu3 %v2711_v1  ;;  %v2843_v18 = vor.u32 %v3840_v15, %v2840_v16  ;;  %v2678_v19 = vld [vmem:[%s6065_s5 + $0x80] sm:$0xf]  ;;  %v3802_v20 = vld [vmem:[%s6065_s5 + $0x8c] sm:$0xf0]  ;;  %v3836_v24 = vld [vmem:[%s6065_s5 + $0x1a4] sm:$0xf] }
  0x15   :  { %190 = vmatpush.bf16.msra.mxu1 %v2575_v34  ;;  %v2822_v22 = vld [vmem:[%s6065_s5 + $0x1a0] sm:$0xf]  ;;  %v3838_v23 = vld [vmem:[%s6065_s5 + $0x1ac] sm:$0xf0]  ;;  %v3800_v25 = vld [vmem:[%s6065_s5 + $0x84] sm:$0xf]  ;;  %v2679_v31 = vor.u32 %v3802_v20, %v2678_v19 }
  0x16   :  { %203 = vmatpush.bf16.msra.mxu2 %v2579_v35  ;;  %v2680_v26 = vld [vmem:[%s6065_s5 + $0x90] sm:$0xf0]  ;;  %v2823_v28 = vor.u32 %v3838_v23, %v2822_v22  ;;  %v2806_v30 = vld [vmem:[%s6065_s5 + $0x180] sm:$0xf]  ;;  %v3834_v32 = vld [vmem:[%s6065_s5 + $0x18c] sm:$0xf0] }
  0x17   :  { %v2824_v27 = vld [vmem:[%s6065_s5 + $0x1b0] sm:$0xf0]  ;;  %614 = vmatpush.bf16.msrb.mxu0 %v2839_v14  ;;  %v3832_v33 = vld [vmem:[%s6065_s5 + $0x184] sm:$0xf]  ;;  %v2683_v35 = vor.u32 %v3800_v25, %v2680_v26  ;;  %v2662_v36 = vld [vmem:[%s6065_s5 + $0x60] sm:$0xf] }
  0x18   :  { %v2827_v29 = vor.u32 %v3836_v24, %v2824_v27  ;;  %602 = vmatpush.bf16.msra.mxu3 %v2695_v17  ;;  %v2808_v34 = vld [vmem:[%s6065_s5 + $0x190] sm:$0xf0]  ;;  %v3798_v37 = vld [vmem:[%s6065_s5 + $0x6c] sm:$0xf0]  ;;  %v3796_v38 = vld [vmem:[%s6065_s5 + $0x64] sm:$0xf] }
  0x19   :  { %191 = vmatpush.bf16.msra.mxu1 %v2567_v40  ;;  %v2664_v39 = vld [vmem:[%s6065_s5 + $0x70] sm:$0xf0]  ;;  %v2807_v40 = vor.u32 %v3834_v32, %v2806_v30  ;;  %v2790_v42 = vld [vmem:[%s6065_s5 + $0x160] sm:$0xf]  ;;  %v2663_v43 = vor.u32 %v3798_v37, %v2662_v36  ;;  %v3830_v44 = vld [vmem:[%s6065_s5 + $0x16c] sm:$0xf0] }
  0x1a   :  { %204 = vmatpush.bf16.msra.mxu2 %v2571_v41  ;;  %v2811_v41 = vor.u32 %v3832_v33, %v2808_v34  ;;  %v2792_v46 = vld [vmem:[%s6065_s5 + $0x170] sm:$0xf0]  ;;  %v2646_v48 = vld [vmem:[%s6065_s5 + $0x40] sm:$0xf]  ;;  %v3794_v49 = vld [vmem:[%s6065_s5 + $0x4c] sm:$0xf0]  ;;  %v2791_v52 = vor.u32 %v3830_v44, %v2790_v42 }
  0x1b   :  { %615 = vmatpush.bf16.msrb.mxu0 %v2823_v28  ;;  %v3792_v50 = vld [vmem:[%s6065_s5 + $0x44] sm:$0xf]  ;;  %v2774_v54 = vld [vmem:[%s6065_s5 + $0x140] sm:$0xf]  ;;  %v2647_v55 = vor.u32 %v3794_v49, %v2646_v48  ;;  %v3826_v56 = vld [vmem:[%s6065_s5 + $0x14c] sm:$0xf0] }
  0x1c   :  { %603 = vmatpush.bf16.msra.mxu3 %v2679_v31  ;;  %v3824_v57 = vld [vmem:[%s6065_s5 + $0x144] sm:$0xf]  ;;  %v2776_v58 = vld [vmem:[%s6065_s5 + $0x150] sm:$0xf0]  ;;  %v2630_v60 = vld [vmem:[%s6065_s5 + $0x20] sm:$0xf]  ;;  %v2775_v1 = vor.u32 %v3826_v56, %v2774_v54 }
  0x1d   :  { %192 = vmatpush.bf16.msra.mxu1 %v2559_v45  ;;  %v3828_v45 = vld [vmem:[%s6065_s5 + $0x164] sm:$0xf]  ;;  %v4072_v62 = vld [vmem:[%s6064_s2] ss:$0 sm:$0xff]  ;;  %v2632_v0 = vld [vmem:[%s6065_s5 + $0x30] sm:$0xf0]  ;;  %v2779_v2 = vor.u32 %v3824_v57, %v2776_v58 }
  0x1e   :  { %205 = vmatpush.bf16.msra.mxu2 %v2563_v47  ;;  %v2667_v47 = vor.u32 %v3796_v38, %v2664_v39  ;;  %v3788_v63 = vld [vmem:[%s6065_s5 + $0x24] sm:$0xf]  ;;  %v2758_v3 = vld [vmem:[%s6065_s5 + $0x120] sm:$0xf]  ;;  %v3786_v6 = vld [vmem:[%s6065_s5 + $0xc] sm:$0xf0] }
  0x1f   :  { %616 = vmatpush.bf16.msrb.mxu0 %v2807_v40  ;;  %v3820_v8 = vld [vmem:[%s6065_s5 + $0x124] sm:$0xf]  ;;  %v2760_v9 = vld [vmem:[%s6065_s5 + $0x130] sm:$0xf0]  ;;  %v2635_v11 = vor.u32 %v3788_v63, %v2632_v0  ;;  %v2734_v14 = vld [vmem:[%s6065_s5 + $0xe8] sm:$0xf] }
  0x20   :  { %604 = vmatpush.bf16.msra.mxu3 %v2663_v43  ;;  %v3784_v12 = vld [vmem:[%s6065_s5 + $0x4] sm:$0xf]  ;;  %v2616_v13 = vld [vmem:[%s6065_s5 + $0x10] sm:$0xf0]  ;;  %v3815_v16 = vld [vmem:[%s6065_s5 + $0xf4] sm:$0xf0]  ;;  %v2763_v20 = vor.u32 %v3820_v8, %v2760_v9 }
  0x21   :  { %193 = vmatpush.bf16.msra.mxu1 %v2551_v51  ;;  %v2648_v51 = vld [vmem:[%s6065_s5 + $0x50] sm:$0xf0]  ;;  %v3813_v17 = vld [vmem:[%s6065_s5 + $0xec] sm:$0xf]  ;;  %v3818_v22 = vld [vmem:[%s6065_s5 + $0x10c] sm:$0xf0]  ;;  %v2619_v28 = vor.u32 %v3784_v12, %v2616_v13  ;;  %v2735_v33 = vor.u32 %v3815_v16, %v2734_v14 }
  0x22   :  { %206 = vmatpush.bf16.msra.mxu2 %v2555_v53  ;;  %v2795_v53 = vor.u32 %v3828_v45, %v2792_v46  ;;  %v2651_v59 = vor.u32 %v3792_v50, %v2648_v51  ;;  %v3816_v23 = vld [vmem:[%s6065_s5 + $0x104] sm:$0xf]  ;;  %v2744_v25 = vld [vmem:[%s6065_s5 + $0x110] sm:$0xf0]  ;;  %v2862_v26 = vld [vmem:[%s6065_s5 + $0x1e8] sm:$0xf] }
  0x23   :  { %617 = vmatpush.bf16.msrb.mxu0 %v2791_v52  ;;  %v3845_v30 = vld [vmem:[%s6065_s5 + $0x1ec] sm:$0xf]  ;;  %v2864_v31 = vld [vmem:[%s6065_s5 + $0x1f8] sm:$0xf0]  ;;  %v3811_v36 = vld [vmem:[%s6065_s5 + $0xd4] sm:$0xf0]  ;;  %v2747_v40 = vor.u32 %v3816_v23, %v2744_v25 }
  0x24   :  { %605 = vmatpush.bf16.msra.mxu3 %v2647_v55  ;;  %v3809_v37 = vld [vmem:[%s6065_s5 + $0xcc] sm:$0xf]  ;;  %v2720_v38 = vld [vmem:[%s6065_s5 + $0xd8] sm:$0xf0]  ;;  %v2867_v42 = vor.u32 %v3845_v30, %v2864_v31  ;;  %v2702_v46 = vld [vmem:[%s6065_s5 + $0xa8] sm:$0xf] }
  0x25   :  { %626 = vmatpush.bf16.msrb.mxu1 %v2731_v61  ;;  %v3790_v61 = vld [vmem:[%s6065_s5 + $0x2c] sm:$0xf0]  ;;  %v2723_v45 = vor.u32 %v3809_v37, %v2720_v38  ;;  %v3805_v48 = vld [vmem:[%s6065_s5 + $0xac] sm:$0xf]  ;;  %v2704_v50 = vld [vmem:[%s6065_s5 + $0xb8] sm:$0xf0] }
  0x26   :  { %639 = vmatpush.bf16.msrb.mxu2 %v2859_v7  ;;  %v2631_v4 = vor.u32 %v3790_v61, %v2630_v60  ;;  %v3822_v7 = vld [vmem:[%s6065_s5 + $0x12c] sm:$0xf0]  ;;  %v2707_v51 = vor.u32 %v3805_v48, %v2704_v50  ;;  %v2846_v52 = vld [vmem:[%s6065_s5 + $0x1c8] sm:$0xf]  ;;  %v3841_v54 = vld [vmem:[%s6065_s5 + $0x1cc] sm:$0xf] }
  0x27   :  { %618 = vmatpush.bf16.msrb.mxu0 %v2775_v1  ;;  %v2759_v19 = vor.u32 %v3822_v7, %v2758_v3  ;;  %v2848_v56 = vld [vmem:[%s6065_s5 + $0x1d8] sm:$0xf0]  ;;  %v2686_v58 = vld [vmem:[%s6065_s5 + $0x88] sm:$0xf]  ;;  %v3801_v60 = vld [vmem:[%s6065_s5 + $0x8c] sm:$0xf] }
  0x28   :  { %606 = vmatpush.bf16.msra.mxu3 %v2631_v4  ;;  %v2851_v57 = vor.u32 %v3841_v54, %v2848_v56  ;;  %v2830_v0 = vld [vmem:[%s6065_s5 + $0x1a8] sm:$0xf]  ;;  %v3839_v1 = vld [vmem:[%s6065_s5 + $0x1b4] sm:$0xf0]  ;;  %v2832_v4 = vld [vmem:[%s6065_s5 + $0x1b8] sm:$0xf0] }
  0x29   :  { %627 = vmatpush.bf16.msrb.mxu1 %v2715_v5  ;;  %v2614_v5 = vld [vmem:[%s6065_s5] sm:$0xf]  ;;  %v2831_v3 = vor.u32 %v3839_v1, %v2830_v0  ;;  %v3799_v7 = vld [vmem:[%s6065_s5 + $0x74] sm:$0xf0]  ;;  %v3797_v9 = vld [vmem:[%s6065_s5 + $0x6c] sm:$0xf] }
  0x2a   :  { %640 = vmatpush.bf16.msrb.mxu2 %v2843_v18  ;;  %v2736_v18 = vld [vmem:[%s6065_s5 + $0xf8] sm:$0xf0]  ;;  %v2615_v27 = vor.u32 %v3786_v6, %v2614_v5  ;;  %v2670_v6 = vld [vmem:[%s6065_s5 + $0x68] sm:$0xf]  ;;  %v3835_v13 = vld [vmem:[%s6065_s5 + $0x194] sm:$0xf0] }
  0x2b   :  { %v2739_v34 = vor.u32 %v3813_v17, %v2736_v18  ;;  %619 = vmatpush.bf16.msrb.mxu0 %v2759_v19  ;;  %v2671_v8 = vor.u32 %v3799_v7, %v2670_v6  ;;  %v2814_v12 = vld [vmem:[%s6065_s5 + $0x188] sm:$0xf]  ;;  %v3833_v14 = vld [vmem:[%s6065_s5 + $0x18c] sm:$0xf]  ;;  %v2816_v16 = vld [vmem:[%s6065_s5 + $0x198] sm:$0xf0] }
  0x2c   :  { %607 = vmatpush.bf16.msra.mxu3 %v2615_v27  ;;  %v2819_v17 = vor.u32 %v3833_v14, %v2816_v16  ;;  %v2654_v18 = vld [vmem:[%s6065_s5 + $0x48] sm:$0xf]  ;;  %v3795_v19 = vld [vmem:[%s6065_s5 + $0x54] sm:$0xf0]  ;;  %v3821_v50 = vld [vmem:[%s6065_s5 + $0x12c] sm:$0xf] }
  0x2d   :  { %628 = vmatpush.bf16.msrb.mxu1 %v2699_v21  ;;  %v2742_v21 = vld [vmem:[%s6065_s5 + $0x100] sm:$0xf]  ;;  %v3831_v25 = vld [vmem:[%s6065_s5 + $0x174] sm:$0xf0]  ;;  %v2638_v30 = vld [vmem:[%s6065_s5 + $0x28] sm:$0xf] }
  0x2e   :  { %641 = vmatpush.bf16.msrb.mxu2 %v2827_v29  ;;  %v3847_v29 = vld [vmem:[%s6065_s5 + $0x1f4] sm:$0xf0]  ;;  %v2743_v39 = vor.u32 %v3818_v22, %v2742_v21  ;;  %v2655_v21 = vor.u32 %v3795_v19, %v2654_v18  ;;  %v2656_v22 = vld [vmem:[%s6065_s5 + $0x58] sm:$0xf0]  ;;  %v2766_v48 = vld [vmem:[%s6065_s5 + $0x128] sm:$0xf] }
  0x2f   :  { %v3791_v31 = vld [vmem:[%s6065_s5 + $0x34] sm:$0xf0]  ;;  %v2750_v54 = vld [vmem:[%s6065_s5 + $0x108] sm:$0xf]  ;;  %v3817_v56 = vld [vmem:[%s6065_s5 + $0x10c] sm:$0xf] }
  0x30   :  { %652 = vmatpush.bf16.msrb.mxu3 %v2735_v33  ;;  %620 = vmatpush.bf16.msrb.mxu0 %v2743_v39  ;;  %v2639_v33 = vor.u32 %v3791_v31, %v2638_v30  ;;  %v3825_v39 = vld [vmem:[%s6065_s5 + $0x14c] sm:$0xf]  ;;  %v3066_v0 = vld [vmem:[%s6067_s6 + $0x188] sm:$0xf]  ;;  %v3900_v1 = vld [vmem:[%s6067_s6 + $0x1a0] sm:$0xf0] }
  0x31   :  { %629 = vmatpush.bf16.msrb.mxu1 %v2683_v35  ;;  %v2718_v35 = vld [vmem:[%s6065_s5 + $0xc8] sm:$0xf]  ;;  %v3067_v6 = vor.u32 %v3900_v1, %v3066_v0  ;;  %v3038_v7 = vld [vmem:[%s6067_s6 + $0x150] sm:$0xf]  ;;  %v3956_v16 = vld [vmem:[%s6067_s6 + $0x360] sm:$0xf0] }
  0x32   :  { %642 = vmatpush.bf16.msrb.mxu2 %v2811_v41  ;;  %v2863_v41 = vor.u32 %v3847_v29, %v2862_v26  ;;  %v2719_v44 = vor.u32 %v3811_v36, %v2718_v35  ;;  %v3829_v26 = vld [vmem:[%s6065_s5 + $0x16c] sm:$0xf]  ;;  %v2782_v35 = vld [vmem:[%s6065_s5 + $0x148] sm:$0xf]  ;;  %v3827_v36 = vld [vmem:[%s6065_s5 + $0x154] sm:$0xf0] }
  0x33   :  { %v2783_v38 = vor.u32 %v3827_v36, %v2782_v35  ;;  %v3290_v14 = vld [vmem:[%s6067_s6 + $0x348] sm:$0xf]  ;;  %v4068_v18 = vld [vmem:[%s6067_s6 + $0x6e0] sm:$0xf0]  ;;  %v3949_v31 = vld [vmem:[%s6067_s6 + $0x328] sm:$0xf0] }
  0x34   :  { %665 = vmatpush.bf16.msra.mxu0 %v2863_v41  ;;  %653 = vmatpush.bf16.msrb.mxu3 %v2719_v44  ;;  %v2622_v41 = vld [vmem:[%s6065_s5 + $0x8] sm:$0xf]  ;;  %v3785_v44 = vld [vmem:[%s6065_s5 + $0xc] sm:$0xf]  ;;  %v2982_v35 = vld [vmem:[%s6067_s6 + $0xe0] sm:$0xf] }
  0x35   :  { %630 = vmatpush.bf16.msrb.mxu1 %v2667_v47  ;;  %v3807_v47 = vld [vmem:[%s6065_s5 + $0xb4] sm:$0xf0]  ;;  %v3977_v0 = vld [vmem:[%s6067_s6 + $0x408] sm:$0xf0] }
  0x36   :  { %643 = vmatpush.bf16.msrb.mxu2 %v2795_v53  ;;  %v2703_v49 = vor.u32 %v3807_v47, %v2702_v46  ;;  %v3843_v53 = vld [vmem:[%s6065_s5 + $0x1d4] sm:$0xf0] }
  0x37   :  { %v2847_v55 = vor.u32 %v3843_v53, %v2846_v52  ;;  %v2768_v52 = vld [vmem:[%s6065_s5 + $0x138] sm:$0xf0] }
  0x38   :  { %654 = vmatpush.bf16.msrb.mxu3 %v2703_v49  ;;  %v3823_v49 = vld [vmem:[%s6065_s5 + $0x134] sm:$0xf0]  ;;  %v2771_v53 = vor.u32 %v3821_v50, %v2768_v52  ;;  %v3872_v50 = vld [vmem:[%s6067_s6 + $0xc0] sm:$0xf0] }
  0x39   :  { %631 = vmatpush.bf16.msrb.mxu1 %v2651_v59  ;;  %v3803_v59 = vld [vmem:[%s6065_s5 + $0x94] sm:$0xf0]  ;;  %666 = vmatpush.bf16.msra.mxu0 %v2847_v55  ;;  %v3984_v52 = vld [vmem:[%s6067_s6 + $0x440] sm:$0xf0] }
  0x3a   :  { %644 = vmatpush.bf16.msrb.mxu2 %v2779_v2  ;;  %v2687_v61 = vor.u32 %v3803_v59, %v2686_v58  ;;  %v3837_v2 = vld [vmem:[%s6065_s5 + $0x1ac] sm:$0xf]  ;;  %v3819_v55 = vld [vmem:[%s6065_s5 + $0x114] sm:$0xf0]  ;;  %v2752_v58 = vld [vmem:[%s6065_s5 + $0x118] sm:$0xf0] }
  0x3b   :  { %v2835_v5 = vor.u32 %v3837_v2, %v2832_v4  ;;  %v2755_v59 = vor.u32 %v3817_v56, %v2752_v58  ;;  %v3514_v2 = vld [vmem:[%s6067_s6 + $0x508] sm:$0xf]  ;;  %v3935_v56 = vld [vmem:[%s6067_s6 + $0x2b8] sm:$0xf0] }
  0x3c   :  { %655 = vmatpush.bf16.msrb.mxu3 %v2687_v61  ;;  %v4047_v58 = vld [vmem:[%s6067_s6 + $0x638] sm:$0xf0] }
  0x3d   :  { %632 = vmatpush.bf16.msrb.mxu1 %v2635_v11  ;;  %667 = vmatpush.bf16.msra.mxu0 %v2831_v3  ;;  %v4012_v3 = vld [vmem:[%s6067_s6 + $0x520] sm:$0xf0] }
  0x3e   :  { %645 = vmatpush.bf16.msrb.mxu2 %v2763_v20  ;;  %v3793_v20 = vld [vmem:[%s6065_s5 + $0x4c] sm:$0xf] }
  0x3f   :  { %v2659_v23 = vor.u32 %v3793_v20, %v2656_v22  ;;  %v3886_v22 = vld [vmem:[%s6067_s6 + $0x130] sm:$0xf0] }
  0x40   :  { %656 = vmatpush.bf16.msrb.mxu3 %v2671_v8  ;;  %v3515_v8 = vor.u32 %v4012_v3, %v3514_v2  ;;  %v3178_v2 = vld [vmem:[%s6067_s6 + $0x268] sm:$0xf] }
  0x41   :  { %633 = vmatpush.bf16.msrb.mxu1 %v2619_v28  ;;  %v2800_v28 = vld [vmem:[%s6065_s5 + $0x178] sm:$0xf0] }
  0x42   :  { %646 = vmatpush.bf16.msrb.mxu2 %v2747_v40  ;;  %v2803_v29 = vor.u32 %v3829_v26, %v2800_v28  ;;  %v2784_v40 = vld [vmem:[%s6065_s5 + $0x158] sm:$0xf0]  ;;  %v3998_v26 = vld [vmem:[%s6067_s6 + $0x4b0] sm:$0xf0]  ;;  %v3262_v28 = vld [vmem:[%s6067_s6 + $0x310] sm:$0xf] }
  0x44   :  { %657 = vmatpush.bf16.msrb.mxu3 %v2655_v21  ;;  %v3010_v21 = vld [vmem:[%s6067_s6 + $0x118] sm:$0xf] }
  0x48   :  { %658 = vmatpush.bf16.msrb.mxu3 %v2639_v33  ;;  %v4061_v33 = vld [vmem:[%s6067_s6 + $0x6a8] sm:$0xf0] }
  0x8e   :  { %v78_v10 = vpop.f32.mrf.mxu0 }
  0x8f   :  { %v79_v15 = vadd.f32 %v4072_v62, %v78_v10  ;;  %v2688_v62 = vld [vmem:[%s6065_s5 + $0x98] sm:$0xf0] }
  0x90   :  { %v2691_v63 = vor.u32 %v3801_v60, %v2688_v62  ;;  %v2672_v10 = vld [vmem:[%s6065_s5 + $0x78] sm:$0xf0]  ;;  %v100_v60 = vld [vmem:[%s6066_s4] sm:$0x3] }
  0x91   :  { %v82_v24 = vmax.f32 %v79_v15, 0.0  ;;  %v2675_v11 = vor.u32 %v3797_v9, %v2672_v10  ;;  %v2815_v15 = vor.u32 %v3835_v13, %v2814_v12  ;;  %v102_v61 = vperm.slane %v100_v60, 0  ;;  %v3893_v10 = vld [vmem:[%s6067_s6 + $0x168] sm:$0xf0] }
  0x92   :  { %v4005_v12 = vld [vmem:[%s6067_s6 + $0x4e8] sm:$0xf0]  ;;  %v3039_v20 = vor.u32 %v3893_v10, %v3038_v7  ;;  %v3858_v10 = vld [vmem:[%s6067_s6 + $0x50] sm:$0xf0] }
  0x93   :  { %v83_v32 = vpack.c.bf16 %v82_v24, %v82_v24  ;;  %668 = vmatpush.bf16.msra.mxu0 %v2815_v15  ;;  %v2798_v24 = vld [vmem:[%s6065_s5 + $0x168] sm:$0xf] }
  0x94   :  { %v2799_v27 = vor.u32 %v3831_v25, %v2798_v24  ;;  %v3458_v25 = vld [vmem:[%s6067_s6 + $0x498] sm:$0xf] }
  0x95   :  { %194 = vmatmul.bf16.vlgmr.msra.gmra.mxu1 %v83_v32  ;;  %207 = vmatmul.bf16.vlgmr.msra.gmra.mxu2 %v83_v32  ;;  %v3789_v32 = vld [vmem:[%s6065_s5 + $0x2c] sm:$0xf]  ;;  %v3459_v36 = vor.u32 %v3998_v26, %v3458_v25 }
  0x96   :  { %v80_v43 = vpop.f32.mrf.mxu0  ;;  %678 = vmatpush.bf16.msra.mxu1 %v2739_v34  ;;  %691 = vmatpush.bf16.msra.mxu2 %v2867_v42  ;;  %v2640_v34 = vld [vmem:[%s6065_s5 + $0x38] sm:$0xf0]  ;;  %v2787_v42 = vor.u32 %v3825_v39, %v2784_v40  ;;  %v3897_v26 = vld [vmem:[%s6067_s6 + $0x18c] sm:$0xf] }
  0x97   :  { %669 = vmatpush.bf16.msra.mxu0 %v2799_v27  ;;  %v2643_v37 = vor.u32 %v3789_v32, %v2640_v34  ;;  %v3787_v43 = vld [vmem:[%s6065_s5 + $0x14] sm:$0xf0]  ;;  %v3291_v27 = vor.u32 %v3956_v16, %v3290_v14  ;;  %v3710_v32 = vld [vmem:[%s6067_s6 + $0x690] sm:$0xf]  ;;  %v3011_v34 = vor.u32 %v3886_v22, %v3010_v21  ;;  %v3991_v39 = vld [vmem:[%s6067_s6 + $0x478] sm:$0xf0] }
  0x98   :  { %v2623_v46 = vor.u32 %v3787_v43, %v2622_v41  ;;  %v3263_v41 = vor.u32 %v3949_v31, %v3262_v28  ;;  %v3711_v43 = vor.u32 %v4061_v33, %v3710_v32  ;;  %v3150_v14 = vld [vmem:[%s6067_s6 + $0x230] sm:$0xf]  ;;  %v3921_v16 = vld [vmem:[%s6067_s6 + $0x248] sm:$0xf0]  ;;  %v3851_v22 = vld [vmem:[%s6067_s6 + $0x18] sm:$0xf0] }
  0x99   :  { %v3151_v25 = vor.u32 %v3921_v16, %v3150_v14  ;;  %v3180_v14 = vld [vmem:[%s6067_s6 + $0x284] sm:$0xf0] }
  0x9a   :  { %679 = vmatpush.bf16.msra.mxu1 %v2723_v45  ;;  %692 = vmatpush.bf16.msra.mxu2 %v2851_v57  ;;  %v2624_v45 = vld [vmem:[%s6065_s5 + $0x18] sm:$0xf0]  ;;  %v2751_v57 = vor.u32 %v3819_v55, %v2750_v54  ;;  %v3206_v54 = vld [vmem:[%s6067_s6 + $0x2a0] sm:$0xf] }
  0x9b   :  { %v2627_v47 = vor.u32 %v3785_v44, %v2624_v45  ;;  %670 = vmatpush.bf16.msra.mxu0 %v2783_v38  ;;  %659 = vmatpush.bf16.msrb.mxu3 %v2623_v46  ;;  %v3430_v38 = vld [vmem:[%s6067_s6 + $0x460] sm:$0xf]  ;;  %v3942_v44 = vld [vmem:[%s6067_s6 + $0x2f0] sm:$0xf0]  ;;  %v3682_v45 = vld [vmem:[%s6067_s6 + $0x658] sm:$0xf]  ;;  %v3207_v1 = vor.u32 %v3935_v56, %v3206_v54 }
  0x9c   :  { %v4054_v46 = vld [vmem:[%s6067_s6 + $0x670] sm:$0xf0]  ;;  %v3869_v56 = vld [vmem:[%s6067_s6 + $0xac] sm:$0xf] }
  0x9d   :  { %v3683_v55 = vor.u32 %v4054_v46, %v3682_v45  ;;  %v3946_v46 = vld [vmem:[%s6067_s6 + $0x314] sm:$0xf] }
  0x9e   :  { %680 = vmatpush.bf16.msra.mxu1 %v2707_v51  ;;  %693 = vmatpush.bf16.msra.mxu2 %v2835_v5  ;;  %v2767_v51 = vor.u32 %v3823_v49, %v2766_v48  ;;  %v103_v5 = vperm.slane %v100_v60, 1  ;;  %v2954_v48 = vld [vmem:[%s6067_s6 + $0xa8] sm:$0xf]  ;;  %v3431_v49 = vor.u32 %v3991_v39, %v3430_v38  ;;  %v2926_v60 = vld [vmem:[%s6067_s6 + $0x70] sm:$0xf] }
  0x9f   :  { %v3907_v38 = vld [vmem:[%s6067_s6 + $0x1d8] sm:$0xf0]  ;;  %v3953_v39 = vld [vmem:[%s6067_s6 + $0x34c] sm:$0xf] }
  0xa0   :  { %671 = vmatpush.bf16.msra.mxu0 %v2767_v51  ;;  %v3402_v51 = vld [vmem:[%s6067_s6 + $0x428] sm:$0xf] }
  0xa2   :  { %681 = vmatpush.bf16.msra.mxu1 %v2691_v63  ;;  %694 = vmatpush.bf16.msra.mxu2 %v2819_v17  ;;  %v3738_v17 = vld [vmem:[%s6067_s6 + $0x6c8] sm:$0xf] }
  0xa4   :  { %672 = vmatpush.bf16.msra.mxu0 %v2751_v57  ;;  %v3654_v57 = vld [vmem:[%s6067_s6 + $0x620] sm:$0xf] }
  0xa5   :  { %v3655_v3 = vor.u32 %v4047_v58, %v3654_v57  ;;  %v2956_v57 = vld [vmem:[%s6067_s6 + $0xc4] sm:$0xf0]  ;;  %v4009_v58 = vld [vmem:[%s6067_s6 + $0x50c] sm:$0xf] }
  0xa6   :  { %682 = vmatpush.bf16.msra.mxu1 %v2675_v11  ;;  %695 = vmatpush.bf16.msra.mxu2 %v2803_v29  ;;  %v3486_v11 = vld [vmem:[%s6067_s6 + $0x4d0] sm:$0xf]  ;;  %v3739_v29 = vor.u32 %v4068_v18, %v3738_v17  ;;  %v4033_v18 = vld [vmem:[%s6067_s6 + $0x5c8] sm:$0xf0] }
  0xa7   :  { %v3598_v17 = vld [vmem:[%s6067_s6 + $0x5b0] sm:$0xf] }
  0xa8   :  { %v3599_v28 = vor.u32 %v4033_v18, %v3598_v17  ;;  %v3740_v17 = vld [vmem:[%s6067_s6 + $0x6e4] sm:$0xf0] }
  0xaa   :  { %683 = vmatpush.bf16.msra.mxu1 %v2659_v23  ;;  %696 = vmatpush.bf16.msra.mxu2 %v2787_v42  ;;  %v3487_v23 = vor.u32 %v4005_v12, %v3486_v11  ;;  %v3234_v42 = vld [vmem:[%s6067_s6 + $0x2d8] sm:$0xf]  ;;  %v3970_v12 = vld [vmem:[%s6067_s6 + $0x3d0] sm:$0xf0] }
  0xab   :  { %v3346_v11 = vld [vmem:[%s6067_s6 + $0x3b8] sm:$0xf] }
  0xac   :  { %v3347_v21 = vor.u32 %v3970_v12, %v3346_v11 }
  0xae   :  { %684 = vmatpush.bf16.msra.mxu1 %v2643_v37  ;;  %697 = vmatpush.bf16.msra.mxu2 %v2771_v53  ;;  %v3879_v37 = vld [vmem:[%s6067_s6 + $0xf8] sm:$0xf0]  ;;  %v3235_v53 = vor.u32 %v3942_v44, %v3234_v42  ;;  %v3012_v44 = vld [vmem:[%s6067_s6 + $0x134] sm:$0xf0] }
  0xb2   :  { %685 = vmatpush.bf16.msra.mxu1 %v2627_v47  ;;  %698 = vmatpush.bf16.msra.mxu2 %v2755_v59  ;;  %v2983_v47 = vor.u32 %v3879_v37, %v2982_v35  ;;  %v2955_v59 = vor.u32 %v3872_v50, %v2954_v48  ;;  %v3890_v35 = vld [vmem:[%s6067_s6 + $0x154] sm:$0xf]  ;;  %v3094_v37 = vld [vmem:[%s6067_s6 + $0x1c0] sm:$0xf] }
  0xb3   :  { %v3095_v42 = vor.u32 %v3907_v38, %v3094_v37  ;;  %v2984_v50 = vld [vmem:[%s6067_s6 + $0xfc] sm:$0xf0]  ;;  %v3911_v37 = vld [vmem:[%s6067_s6 + $0x1fc] sm:$0xf]  ;;  %v3124_v38 = vld [vmem:[%s6067_s6 + $0x214] sm:$0xf0] }
 0x112   :  { %v195_v62 = vpop.f32.mrf.mxu1 }
 0x113   :  { %v196_v63 = vadd.f32 %v195_v62, %v102_v61  ;;  %v3403_v61 = vor.u32 %v3984_v52, %v3402_v51  ;;  %v3865_v62 = vld [vmem:[%s6067_s6 + $0x88] sm:$0xf0]  ;;  %v3939_v52 = vld [vmem:[%s6067_s6 + $0x2dc] sm:$0xf] }
 0x114   :  { %v2927_v7 = vor.u32 %v3865_v62, %v2926_v60  ;;  %v3516_v60 = vld [vmem:[%s6067_s6 + $0x524] sm:$0xf0]  ;;  %v4026_v62 = vld [vmem:[%s6067_s6 + $0x590] sm:$0xf0] }
 0x115   :  { %v212_v4 = vmax.f32 %v196_v63, 0.0  ;;  %v3374_v63 = vld [vmem:[%s6067_s6 + $0x3f0] sm:$0xf] }
 0x117   :  { %v4657_v9 = vpack.c.bf16 %v212_v4, %v212_v4  ;;  %v3928_v4 = vld [vmem:[%s6067_s6 + $0x280] sm:$0xf0] }
 0x118   :  { %v208_v13 = vpop.f32.mrf.mxu2 }
 0x119   :  { %v209_v15 = vadd.f32 %v208_v13, %v103_v5  ;;  %608 = vmatmul.bf16.vlgmr.msra.gmra.mxu3 %v4657_v9  ;;  %634 = vmatmul.bf16.vlgmr.msrb.gmra.mxu1 %v4657_v9  ;;  %v3626_v5 = vld [vmem:[%s6067_s6 + $0x5e8] sm:$0xf]  ;;  %v3179_v13 = vor.u32 %v3928_v4, %v3178_v2  ;;  %v3208_v2 = vld [vmem:[%s6067_s6 + $0x2bc] sm:$0xf0]  ;;  %v3862_v4 = vld [vmem:[%s6067_s6 + $0x74] sm:$0xf] }
 0x11a   :  { %v197_v19 = vpop.f32.mrf.mxu1  ;;  %2120 = vmatpush.bf16.msra.mxu3 %v3067_v6  ;;  %2146 = vmatpush.bf16.msrb.mxu1 %v3515_v8  ;;  %v4040_v6 = vld [vmem:[%s6067_s6 + $0x600] sm:$0xf0]  ;;  %v2898_v8 = vld [vmem:[%s6067_s6 + $0x38] sm:$0xf] }
 0x11b   :  { %v213_v24 = vmax.f32 %v209_v15, 0.0  ;;  %v3627_v15 = vor.u32 %v4040_v6, %v3626_v5  ;;  %v2899_v19 = vor.u32 %v3858_v10, %v2898_v8  ;;  %v2928_v5 = vld [vmem:[%s6067_s6 + $0x8c] sm:$0xf0]  ;;  %v4002_v6 = vld [vmem:[%s6067_s6 + $0x4d4] sm:$0xf] }
 0x11c   :  { %v3488_v8 = vld [vmem:[%s6067_s6 + $0x4ec] sm:$0xf0]  ;;  %v4019_v10 = vld [vmem:[%s6067_s6 + $0x558] sm:$0xf0] }
 0x11d   :  { %v4697_v30 = vpack.c.bf16 %v213_v24, %v213_v24  ;;  %v3963_v24 = vld [vmem:[%s6067_s6 + $0x398] sm:$0xf0]  ;;  %v3491_v11 = vor.u32 %v4002_v6, %v3488_v8  ;;  %v3544_v8 = vld [vmem:[%s6067_s6 + $0x55c] sm:$0xf0] }
 0x11e   :  { %2121 = vmatpush.bf16.msra.mxu3 %v3039_v20  ;;  %2147 = vmatpush.bf16.msrb.mxu1 %v3487_v23  ;;  %v2870_v20 = vld [vmem:[%s6067_s6] sm:$0xf] }
 0x11f   :  { %621 = vmatmul.bf16.vlgmr.msrb.gmra.mxu0 %v4697_v30  ;;  %647 = vmatmul.bf16.vlgmr.msrb.gmra.mxu2 %v4697_v30  ;;  %v3318_v23 = vld [vmem:[%s6067_s6 + $0x380] sm:$0xf]  ;;  %v2871_v31 = vor.u32 %v3851_v22, %v2870_v20  ;;  %v2900_v20 = vld [vmem:[%s6067_s6 + $0x54] sm:$0xf0] }
 0x120   :  { %v210_v40 = vpop.f32.mrf.mxu2  ;;  %2133 = vmatpush.bf16.msrb.mxu0 %v3291_v27  ;;  %2159 = vmatpush.bf16.msrb.mxu2 %v3739_v29  ;;  %v3068_v27 = vld [vmem:[%s6067_s6 + $0x1a4] sm:$0xf0]  ;;  %v3122_v29 = vld [vmem:[%s6067_s6 + $0x1f8] sm:$0xf]  ;;  %v3319_v32 = vor.u32 %v3963_v24, %v3318_v23 }
 0x121   :  { %v3071_v33 = vor.u32 %v3897_v26, %v3068_v27  ;;  %v3292_v40 = vld [vmem:[%s6067_s6 + $0x364] sm:$0xf0]  ;;  %v3460_v23 = vld [vmem:[%s6067_s6 + $0x4b4] sm:$0xf0]  ;;  %v3152_v26 = vld [vmem:[%s6067_s6 + $0x24c] sm:$0xf0] }
 0x122   :  { %2122 = vmatpush.bf16.msra.mxu3 %v3011_v34  ;;  %2148 = vmatpush.bf16.msrb.mxu1 %v3459_v36  ;;  %v3040_v36 = vld [vmem:[%s6067_s6 + $0x16c] sm:$0xf0]  ;;  %v3295_v45 = vor.u32 %v3953_v39, %v3292_v40  ;;  %v4058_v27 = vld [vmem:[%s6067_s6 + $0x694] sm:$0xf]  ;;  %v4051_v39 = vld [vmem:[%s6067_s6 + $0x65c] sm:$0xf]  ;;  %v3127_v40 = vor.u32 %v3911_v37, %v3124_v38 }
 0x123   :  { %v2990_v37 = vld [vmem:[%s6067_s6 + $0xe8] sm:$0xf]  ;;  %v3880_v38 = vld [vmem:[%s6067_s6 + $0x100] sm:$0xf0] }
 0x124   :  { %2134 = vmatpush.bf16.msrb.mxu0 %v3263_v41  ;;  %2160 = vmatpush.bf16.msrb.mxu2 %v3711_v43  ;;  %v3043_v41 = vor.u32 %v3890_v35, %v3040_v36  ;;  %v3883_v43 = vld [vmem:[%s6067_s6 + $0x11c] sm:$0xf]  ;;  %v3432_v35 = vld [vmem:[%s6067_s6 + $0x47c] sm:$0xf0] }
 0x125   :  { %v3015_v48 = vor.u32 %v3883_v43, %v3012_v44  ;;  %v3981_v43 = vld [vmem:[%s6067_s6 + $0x42c] sm:$0xf]  ;;  %v3404_v44 = vld [vmem:[%s6067_s6 + $0x444] sm:$0xf0] }
 0x126   :  { %2123 = vmatpush.bf16.msra.mxu3 %v2983_v47  ;;  %2149 = vmatpush.bf16.msrb.mxu1 %v3431_v49  ;;  %v3264_v47 = vld [vmem:[%s6067_s6 + $0x32c] sm:$0xf0]  ;;  %v3876_v49 = vld [vmem:[%s6067_s6 + $0xe4] sm:$0xf] }
 0x127   :  { %v3267_v51 = vor.u32 %v3946_v46, %v3264_v47  ;;  %v2987_v54 = vor.u32 %v3876_v49, %v2984_v50  ;;  %v3904_v46 = vld [vmem:[%s6067_s6 + $0x1c4] sm:$0xf]  ;;  %v3096_v47 = vld [vmem:[%s6067_s6 + $0x1dc] sm:$0xf0] }
 0x128   :  { %2135 = vmatpush.bf16.msrb.mxu0 %v3235_v53  ;;  %2161 = vmatpush.bf16.msrb.mxu2 %v3683_v55  ;;  %v3236_v53 = vld [vmem:[%s6067_s6 + $0x2f4] sm:$0xf0]  ;;  %v3099_v49 = vor.u32 %v3904_v46, %v3096_v47  ;;  %v3656_v50 = vld [vmem:[%s6067_s6 + $0x63c] sm:$0xf0]  ;;  %v2962_v46 = vld [vmem:[%s6067_s6 + $0xb0] sm:$0xf] }
 0x129   :  { %660 = vmatmul.bf16.vlgmr.msrb.gmra.mxu3 %v4657_v9  ;;  %686 = vmatmul.bf16.vlgmr.msra.gmra.mxu1 %v4657_v9  ;;  %v3375_v9 = vor.u32 %v3977_v0, %v3374_v63  ;;  %v3239_v55 = vor.u32 %v3939_v52, %v3236_v53  ;;  %v3519_v63 = vor.u32 %v4009_v58, %v3516_v60  ;;  %v3974_v52 = vld [vmem:[%s6067_s6 + $0x3f4] sm:$0xf]  ;;  %v3376_v53 = vld [vmem:[%s6067_s6 + $0x40c] sm:$0xf0]  ;;  %v3967_v58 = vld [vmem:[%s6067_s6 + $0x3bc] sm:$0xf] }
 0x12a   :  { %2124 = vmatpush.bf16.msra.mxu3 %v2955_v59  ;;  %2150 = vmatpush.bf16.msrb.mxu1 %v3403_v61  ;;  %v2959_v59 = vor.u32 %v3869_v56, %v2956_v57  ;;  %v3570_v61 = vld [vmem:[%s6067_s6 + $0x578] sm:$0xf]  ;;  %v3628_v56 = vld [vmem:[%s6067_s6 + $0x604] sm:$0xf0] }
 0x12b   :  { %v3571_v0 = vor.u32 %v4026_v62, %v3570_v61  ;;  %v4030_v61 = vld [vmem:[%s6067_s6 + $0x5b4] sm:$0xf]  ;;  %v3600_v62 = vld [vmem:[%s6067_s6 + $0x5cc] sm:$0xf0] }
 0x12c   :  { %2136 = vmatpush.bf16.msrb.mxu0 %v3207_v1  ;;  %2162 = vmatpush.bf16.msrb.mxu2 %v3655_v3  ;;  %v3932_v1 = vld [vmem:[%s6067_s6 + $0x2a4] sm:$0xf] }
 0x12d   :  { %v3211_v3 = vor.u32 %v3932_v1, %v3208_v2  ;;  %v3320_v1 = vld [vmem:[%s6067_s6 + $0x39c] sm:$0xf0] }
 0x12e   :  { %2125 = vmatpush.bf16.msra.mxu3 %v2927_v7  ;;  %2151 = vmatpush.bf16.msrb.mxu1 %v3375_v9  ;;  %v2931_v7 = vor.u32 %v3862_v4, %v2928_v5  ;;  %v3542_v9 = vld [vmem:[%s6067_s6 + $0x540] sm:$0xf]  ;;  %v3572_v4 = vld [vmem:[%s6067_s6 + $0x594] sm:$0xf0] }
 0x12f   :  { %673 = vmatmul.bf16.vlgmr.msra.gmra.mxu0 %v4697_v30  ;;  %699 = vmatmul.bf16.vlgmr.msra.gmra.mxu2 %v4697_v30  ;;  %v3914_v30 = vld [vmem:[%s6067_s6 + $0x210] sm:$0xf0]  ;;  %v3543_v12 = vor.u32 %v4019_v10, %v3542_v9 }
 0x130   :  { %2137 = vmatpush.bf16.msrb.mxu0 %v3179_v13  ;;  %2163 = vmatpush.bf16.msrb.mxu2 %v3627_v15  ;;  %v3123_v34 = vor.u32 %v3914_v30, %v3122_v29  ;;  %v3925_v13 = vld [vmem:[%s6067_s6 + $0x26c] sm:$0xf]  ;;  %v3712_v29 = vld [vmem:[%s6067_s6 + $0x6ac] sm:$0xf0] }
 0x131   :  { %v4065_v15 = vld [vmem:[%s6067_s6 + $0x6cc] sm:$0xf]  ;;  %v3183_v16 = vor.u32 %v3925_v13, %v3180_v14  ;;  %v3715_v30 = vor.u32 %v4058_v27, %v3712_v29  ;;  %v3074_v13 = vld [vmem:[%s6067_s6 + $0x190] sm:$0xf]  ;;  %v3018_v29 = vld [vmem:[%s6067_s6 + $0x120] sm:$0xf] }
 0x132   :  { %2126 = vmatpush.bf16.msra.mxu3 %v2899_v19  ;;  %2152 = vmatpush.bf16.msrb.mxu1 %v3347_v21  ;;  %v3743_v18 = vor.u32 %v4065_v15, %v3740_v17  ;;  %v3855_v19 = vld [vmem:[%s6067_s6 + $0x3c] sm:$0xf]  ;;  %v3901_v14 = vld [vmem:[%s6067_s6 + $0x1a8] sm:$0xf0] }
 0x133   :  { %v3995_v21 = vld [vmem:[%s6067_s6 + $0x49c] sm:$0xf]  ;;  %v2903_v22 = vor.u32 %v3855_v19, %v2900_v20  ;;  %v3075_v17 = vor.u32 %v3901_v14, %v3074_v13  ;;  %v3046_v19 = vld [vmem:[%s6067_s6 + $0x158] sm:$0xf]  ;;  %v3894_v20 = vld [vmem:[%s6067_s6 + $0x170] sm:$0xf0] }
 0x134   :  { %2138 = vmatpush.bf16.msrb.mxu0 %v3151_v25  ;;  %2164 = vmatpush.bf16.msrb.mxu2 %v3599_v28  ;;  %v3463_v24 = vor.u32 %v3995_v21, %v3460_v23  ;;  %v3918_v25 = vld [vmem:[%s6067_s6 + $0x234] sm:$0xf]  ;;  %v3298_v23 = vld [vmem:[%s6067_s6 + $0x350] sm:$0xf]  ;;  %v3047_v27 = vor.u32 %v3894_v20, %v3046_v19  ;;  %v3466_v13 = vld [vmem:[%s6067_s6 + $0x4a0] sm:$0xf] }
 0x135   :  { %v3155_v28 = vor.u32 %v3918_v25, %v3152_v26  ;;  %v3999_v14 = vld [vmem:[%s6067_s6 + $0x4b8] sm:$0xf0]  ;;  %v3922_v20 = vld [vmem:[%s6067_s6 + $0x250] sm:$0xf0] }
 0x136   :  { %2127 = vmatpush.bf16.msra.mxu3 %v2871_v31  ;;  %2153 = vmatpush.bf16.msrb.mxu1 %v3319_v32  ;;  %v3848_v31 = vld [vmem:[%s6067_s6 + $0x4] sm:$0xf]  ;;  %v2872_v32 = vld [vmem:[%s6067_s6 + $0x1c] sm:$0xf0] }
 0x138   :  { %2139 = vmatpush.bf16.msrb.mxu0 %v3123_v34  ;;  %2165 = vmatpush.bf16.msrb.mxu2 %v3571_v0  ;;  %v2875_v34 = vor.u32 %v3848_v31, %v2872_v32  ;;  %v3960_v0 = vld [vmem:[%s6067_s6 + $0x384] sm:$0xf] }
 0x139   :  { %v3323_v2 = vor.u32 %v3960_v0, %v3320_v1  ;;  %v3186_v1 = vld [vmem:[%s6067_s6 + $0x270] sm:$0xf] }
 0x13a   :  { %2172 = vmatpush.bf16.msrb.mxu3 %v3071_v33  ;;  %2198 = vmatpush.bf16.msra.mxu1 %v3519_v63  ;;  %v3988_v33 = vld [vmem:[%s6067_s6 + $0x464] sm:$0xf]  ;;  %v3603_v63 = vor.u32 %v4030_v61, %v3600_v62  ;;  %v3494_v61 = vld [vmem:[%s6067_s6 + $0x4d8] sm:$0xf]  ;;  %v4006_v62 = vld [vmem:[%s6067_s6 + $0x4f0] sm:$0xf0] }
 0x13b   :  { %v3435_v36 = vor.u32 %v3988_v33, %v3432_v35  ;;  %v3950_v35 = vld [vmem:[%s6067_s6 + $0x330] sm:$0xf0] }
 0x13c   :  { %2140 = vmatpush.bf16.msrb.mxu0 %v3095_v42  ;;  %2166 = vmatpush.bf16.msrb.mxu2 %v3543_v12 }
 0x13e   :  { %2173 = vmatpush.bf16.msrb.mxu3 %v3043_v41  ;;  %2199 = vmatpush.bf16.msra.mxu1 %v3491_v11  ;;  %v3684_v41 = vld [vmem:[%s6067_s6 + $0x674] sm:$0xf0] }
 0x13f   :  { %v3687_v42 = vor.u32 %v4051_v39, %v3684_v41  ;;  %v3242_v41 = vld [vmem:[%s6067_s6 + $0x2e0] sm:$0xf] }
 0x140   :  { %2185 = vmatpush.bf16.msra.mxu0 %v3295_v45  ;;  %2211 = vmatpush.bf16.msra.mxu2 %v3743_v18  ;;  %v3407_v45 = vor.u32 %v3981_v43, %v3404_v44 }
 0x142   :  { %2174 = vmatpush.bf16.msrb.mxu3 %v3015_v48  ;;  %2200 = vmatpush.bf16.msra.mxu1 %v3463_v24  ;;  %v4044_v48 = vld [vmem:[%s6067_s6 + $0x624] sm:$0xf]  ;;  %v3957_v24 = vld [vmem:[%s6067_s6 + $0x368] sm:$0xf0] }
 0x143   :  { %v3299_v32 = vor.u32 %v3957_v24, %v3298_v23  ;;  %v3467_v24 = vor.u32 %v3999_v14, %v3466_v13  ;;  %v4034_v13 = vld [vmem:[%s6067_s6 + $0x5d0] sm:$0xf0] }
 0x144   :  { %2186 = vmatpush.bf16.msra.mxu0 %v3267_v51  ;;  %2212 = vmatpush.bf16.msra.mxu2 %v3715_v30  ;;  %v3659_v51 = vor.u32 %v4044_v48, %v3656_v50  ;;  %v3887_v30 = vld [vmem:[%s6067_s6 + $0x138] sm:$0xf0]  ;;  %v3873_v48 = vld [vmem:[%s6067_s6 + $0xc8] sm:$0xf0] }
 0x145   :  { %v4013_v50 = vld [vmem:[%s6067_s6 + $0x528] sm:$0xf0] }
 0x146   :  { %2175 = vmatpush.bf16.msrb.mxu3 %v2987_v54  ;;  %2201 = vmatpush.bf16.msra.mxu1 %v3435_v36  ;;  %v3379_v54 = vor.u32 %v3974_v52, %v3376_v53  ;;  %v3019_v36 = vor.u32 %v3887_v30, %v3018_v29 }
 0x148   :  { %2187 = vmatpush.bf16.msra.mxu0 %v3239_v55  ;;  %2213 = vmatpush.bf16.msra.mxu2 %v3687_v42  ;;  %v4037_v55 = vld [vmem:[%s6067_s6 + $0x5ec] sm:$0xf]  ;;  %v3943_v42 = vld [vmem:[%s6067_s6 + $0x2f8] sm:$0xf0] }
 0x149   :  { %v3631_v57 = vor.u32 %v4037_v55, %v3628_v56  ;;  %v3243_v52 = vor.u32 %v3943_v42, %v3242_v41  ;;  %v3936_v55 = vld [vmem:[%s6067_s6 + $0x2c0] sm:$0xf0]  ;;  %v2963_v56 = vor.u32 %v3873_v48, %v2962_v46  ;;  %v3410_v42 = vld [vmem:[%s6067_s6 + $0x430] sm:$0xf]  ;;  %v3891_v46 = vld [vmem:[%s6067_s6 + $0x15c] sm:$0xf] }
 0x14a   :  { %2176 = vmatpush.bf16.msrb.mxu3 %v2959_v59  ;;  %2202 = vmatpush.bf16.msra.mxu1 %v3407_v45  ;;  %v3348_v59 = vld [vmem:[%s6067_s6 + $0x3d4] sm:$0xf0]  ;;  %v2991_v45 = vor.u32 %v3880_v38, %v2990_v37  ;;  %v3690_v37 = vld [vmem:[%s6067_s6 + $0x660] sm:$0xf]  ;;  %v4055_v38 = vld [vmem:[%s6067_s6 + $0x678] sm:$0xf0] }
 0x14b   :  { %v3351_v60 = vor.u32 %v3967_v58, %v3348_v59  ;;  %v2934_v58 = vld [vmem:[%s6067_s6 + $0x78] sm:$0xf]  ;;  %v3102_v48 = vld [vmem:[%s6067_s6 + $0x1c8] sm:$0xf] }
 0x14c   :  { %2188 = vmatpush.bf16.msra.mxu0 %v3211_v3  ;;  %2214 = vmatpush.bf16.msra.mxu2 %v3659_v51  ;;  %v4023_v3 = vld [vmem:[%s6067_s6 + $0x57c] sm:$0xf] }
 0x14d   :  { %v3575_v5 = vor.u32 %v4023_v3, %v3572_v4  ;;  %v3929_v3 = vld [vmem:[%s6067_s6 + $0x288] sm:$0xf0]  ;;  %v3746_v4 = vld [vmem:[%s6067_s6 + $0x6d0] sm:$0xf] }
 0x14e   :  { %2177 = vmatpush.bf16.msrb.mxu3 %v2931_v7  ;;  %2203 = vmatpush.bf16.msra.mxu1 %v3379_v54  ;;  %v4016_v7 = vld [vmem:[%s6067_s6 + $0x544] sm:$0xf]  ;;  %v3214_v54 = vld [vmem:[%s6067_s6 + $0x2a8] sm:$0xf] }
 0x14f   :  { %v3547_v9 = vor.u32 %v4016_v7, %v3544_v8  ;;  %v3215_v0 = vor.u32 %v3936_v55, %v3214_v54  ;;  %v3300_v54 = vld [vmem:[%s6067_s6 + $0x36c] sm:$0xf0] }
 0x150   :  { %2189 = vmatpush.bf16.msra.mxu0 %v3183_v16  ;;  %2215 = vmatpush.bf16.msra.mxu2 %v3631_v57 }
 0x152   :  { %2178 = vmatpush.bf16.msrb.mxu3 %v2903_v22  ;;  %2204 = vmatpush.bf16.msra.mxu1 %v3351_v60  ;;  %v3866_v60 = vld [vmem:[%s6067_s6 + $0x90] sm:$0xf0] }
 0x153   :  { %v2935_v8 = vor.u32 %v3866_v60, %v2934_v58 }
 0x154   :  { %2190 = vmatpush.bf16.msra.mxu0 %v3155_v28  ;;  %2216 = vmatpush.bf16.msra.mxu2 %v3603_v63 }
 0x156   :  { %2179 = vmatpush.bf16.msrb.mxu3 %v2875_v34  ;;  %2205 = vmatpush.bf16.msra.mxu1 %v3323_v2  ;;  %v3270_v34 = vld [vmem:[%s6067_s6 + $0x318] sm:$0xf] }
 0x158   :  { %2191 = vmatpush.bf16.msra.mxu0 %v3127_v40  ;;  %2217 = vmatpush.bf16.msra.mxu2 %v3575_v5  ;;  %v3271_v40 = vor.u32 %v3950_v35, %v3270_v34  ;;  %v4069_v5 = vld [vmem:[%s6067_s6 + $0x6e8] sm:$0xf0]  ;;  %v3076_v34 = vld [vmem:[%s6067_s6 + $0x1ac] sm:$0xf0]  ;;  %v3130_v35 = vld [vmem:[%s6067_s6 + $0x200] sm:$0xf] }
 0x15c   :  { %2192 = vmatpush.bf16.msra.mxu0 %v3099_v49  ;;  %2218 = vmatpush.bf16.msra.mxu2 %v3547_v9  ;;  %v3522_v49 = vld [vmem:[%s6067_s6 + $0x510] sm:$0xf]  ;;  %v3495_v9 = vor.u32 %v4006_v62, %v3494_v61  ;;  %v3884_v61 = vld [vmem:[%s6067_s6 + $0x124] sm:$0xf]  ;;  %v3020_v62 = vld [vmem:[%s6067_s6 + $0x13c] sm:$0xf0] }
 0x15d   :  { %v3523_v57 = vor.u32 %v4013_v50, %v3522_v49  ;;  %v3908_v49 = vld [vmem:[%s6067_s6 + $0x1e0] sm:$0xf0]  ;;  %v3662_v50 = vld [vmem:[%s6067_s6 + $0x628] sm:$0xf] }
 0x15e   :  { %v3103_v58 = vor.u32 %v3908_v49, %v3102_v48 }
 0x196   :  { %v635_v6 = vpop.f32.mrf.mxu1 }
 0x19c   :  { %v609_v10 = vpop.f32.mrf.mxu3  ;;  %v622_v11 = vpop.f32.mrf.mxu0 }
 0x19d   :  { %v623_v12 = vadd.f32 %v622_v11, %v609_v10  ;;  %v2906_v10 = vld [vmem:[%s6067_s6 + $0x40] sm:$0xf]  ;;  %v3859_v11 = vld [vmem:[%s6067_s6 + $0x58] sm:$0xf0] }
 0x19e   :  { %v637_v15 = vpop.f32.mrf.mxu1  ;;  %v2907_v23 = vor.u32 %v3859_v11, %v2906_v10  ;;  %v2992_v10 = vld [vmem:[%s6067_s6 + $0x104] sm:$0xf0] }
 0x19f   :  { %v704_v16 = vmax.f32 %v623_v12, 0.0  ;;  %v3187_v15 = vor.u32 %v3929_v3, %v3186_v1  ;;  %v4041_v1 = vld [vmem:[%s6067_s6 + $0x608] sm:$0xf0]  ;;  %v3947_v3 = vld [vmem:[%s6067_s6 + $0x31c] sm:$0xf] }
 0x1a1   :  { %v5044_v18 = vpack.c.bf16 %v704_v16, %v704_v16  ;;  %v3747_v16 = vor.u32 %v4069_v5, %v3746_v4  ;;  %v3272_v4 = vld [vmem:[%s6067_s6 + $0x334] sm:$0xf0]  ;;  %v3023_v5 = vor.u32 %v3884_v61, %v3020_v62 }
 0x1a2   :  { %v648_v21 = vpop.f32.mrf.mxu2  ;;  %v3275_v11 = vor.u32 %v3947_v3, %v3272_v4  ;;  %v3720_v61 = vld [vmem:[%s6067_s6 + $0x6b4] sm:$0xf0]  ;;  %v3440_v3 = vld [vmem:[%s6067_s6 + $0x484] sm:$0xf0] }
 0x1a3   :  { %v649_v22 = vadd.f32 %v648_v21, %v635_v6  ;;  %2128 = vmatmul.bf16.vlgmr.msra.gmra.mxu3 %v5044_v18  ;;  %v3718_v21 = vld [vmem:[%s6067_s6 + $0x698] sm:$0xf] }
 0x1a4   :  { %2224 = vmatpush.bf16.msra.mxu3 %v3075_v17  ;;  %v611_v25 = vpop.f32.mrf.mxu3  ;;  %v624_v26 = vpop.f32.mrf.mxu0  ;;  %v3158_v17 = vld [vmem:[%s6067_s6 + $0x238] sm:$0xf] }
 0x1a5   :  { %v705_v28 = vmax.f32 %v649_v22, 0.0  ;;  %v4062_v22 = vld [vmem:[%s6067_s6 + $0x6b0] sm:$0xf0]  ;;  %v2878_v25 = vld [vmem:[%s6067_s6 + $0x8] sm:$0xf]  ;;  %v3159_v30 = vor.u32 %v3922_v20, %v3158_v17 }
 0x1a6   :  { %v687_v31 = vpop.f32.mrf.mxu1  ;;  %v3852_v26 = vld [vmem:[%s6067_s6 + $0x20] sm:$0xf0]  ;;  %v3326_v20 = vld [vmem:[%s6067_s6 + $0x388] sm:$0xf] }
 0x1a7   :  { %v5065_v33 = vpack.c.bf16 %v705_v28, %v705_v28  ;;  %v3992_v28 = vld [vmem:[%s6067_s6 + $0x480] sm:$0xf0] }
 0x1a8   :  { %2225 = vmatpush.bf16.msra.mxu3 %v3047_v27  ;;  %v3438_v27 = vld [vmem:[%s6067_s6 + $0x468] sm:$0xf] }
 0x1a9   :  { %2141 = vmatmul.bf16.vlgmr.msrb.gmra.mxu0 %v5065_v33 }
 0x1aa   :  { %2237 = vmatpush.bf16.msrb.mxu0 %v3299_v32  ;;  %v650_v39 = vpop.f32.mrf.mxu2  ;;  %v3898_v32 = vld [vmem:[%s6067_s6 + $0x194] sm:$0xf] }
 0x1ab   :  { %v2879_v39 = vor.u32 %v3852_v26, %v2878_v25  ;;  %v3079_v41 = vor.u32 %v3898_v32, %v3076_v34  ;;  %v4010_v25 = vld [vmem:[%s6067_s6 + $0x514] sm:$0xf]  ;;  %v3524_v26 = vld [vmem:[%s6067_s6 + $0x52c] sm:$0xf0]  ;;  %v3216_v32 = vld [vmem:[%s6067_s6 + $0x2c4] sm:$0xf0] }
 0x1ac   :  { %2226 = vmatpush.bf16.msra.mxu3 %v3019_v36  ;;  %v661_v43 = vpop.f32.mrf.mxu3  ;;  %v674_v44 = vpop.f32.mrf.mxu0  ;;  %v3915_v36 = vld [vmem:[%s6067_s6 + $0x218] sm:$0xf0] }
 0x1ad   :  { %v675_v47 = vadd.f32 %v674_v44, %v661_v43  ;;  %v3985_v43 = vld [vmem:[%s6067_s6 + $0x448] sm:$0xf0]  ;;  %v3131_v44 = vor.u32 %v3915_v36, %v3130_v35  ;;  %v3527_v35 = vor.u32 %v4010_v25, %v3524_v26  ;;  %v3863_v36 = vld [vmem:[%s6067_s6 + $0x7c] sm:$0xf]  ;;  %v3664_v26 = vld [vmem:[%s6067_s6 + $0x644] sm:$0xf0] }
 0x1ae   :  { %2238 = vmatpush.bf16.msrb.mxu0 %v3271_v40  ;;  %v689_v51 = vpop.f32.mrf.mxu1  ;;  %v3439_v40 = vor.u32 %v3992_v28, %v3438_v27  ;;  %v3578_v28 = vld [vmem:[%s6067_s6 + $0x580] sm:$0xf]  ;;  %v4045_v25 = vld [vmem:[%s6067_s6 + $0x62c] sm:$0xf] }
 0x1af   :  { %v706_v53 = vmax.f32 %v675_v47, 0.0  ;;  %v3048_v47 = vld [vmem:[%s6067_s6 + $0x174] sm:$0xf0]  ;;  %v4048_v51 = vld [vmem:[%s6067_s6 + $0x640] sm:$0xf0] }
 0x1b0   :  { %2227 = vmatpush.bf16.msra.mxu3 %v2991_v45  ;;  %v3691_v45 = vor.u32 %v4055_v38, %v3690_v37  ;;  %v3051_v55 = vor.u32 %v3891_v46, %v3048_v47  ;;  %v3663_v60 = vor.u32 %v4048_v51, %v3662_v50  ;;  %v2936_v38 = vld [vmem:[%s6067_s6 + $0x94] sm:$0xf0]  ;;  %v4066_v46 = vld [vmem:[%s6067_s6 + $0x6d4] sm:$0xf]  ;;  %v3748_v47 = vld [vmem:[%s6067_s6 + $0x6ec] sm:$0xf0] }
 0x1b1   :  { %v5107_v59 = vpack.c.bf16 %v706_v53, %v706_v53  ;;  %v3954_v53 = vld [vmem:[%s6067_s6 + $0x354] sm:$0xf]  ;;  %v2939_v48 = vor.u32 %v3863_v36, %v2936_v38  ;;  %v3856_v50 = vld [vmem:[%s6067_s6 + $0x44] sm:$0xf]  ;;  %v3026_v36 = vld [vmem:[%s6067_s6 + $0x128] sm:$0xf] }
 0x1b2   :  { %2239 = vmatpush.bf16.msrb.mxu0 %v3243_v52  ;;  %v700_v63 = vpop.f32.mrf.mxu2  ;;  %v3411_v52 = vor.u32 %v3985_v43, %v3410_v42  ;;  %v3550_v42 = vld [vmem:[%s6067_s6 + $0x548] sm:$0xf]  ;;  %v4020_v43 = vld [vmem:[%s6067_s6 + $0x560] sm:$0xf0] }
 0x1b3   :  { %v701_v2 = vadd.f32 %v700_v63, %v687_v31  ;;  %2154 = vmatmul.bf16.vlgmr.msrb.gmra.mxu1 %v5107_v59  ;;  %2180 = vmatmul.bf16.vlgmr.msrb.gmra.mxu3 %v5044_v18  ;;  %v3719_v31 = vor.u32 %v4062_v22, %v3718_v21  ;;  %v3303_v63 = vor.u32 %v3954_v53, %v3300_v54  ;;  %v3964_v21 = vld [vmem:[%s6067_s6 + $0x3a0] sm:$0xf0]  ;;  %v3870_v22 = vld [vmem:[%s6067_s6 + $0xb4] sm:$0xf]  ;;  %v3468_v54 = vld [vmem:[%s6067_s6 + $0x4bc] sm:$0xf0] }
 0x1b4   :  { %2228 = vmatpush.bf16.msra.mxu3 %v2963_v56  ;;  %2250 = vmatpush.bf16.msrb.mxu1 %v3523_v57  ;;  %v663_v6 = vpop.f32.mrf.mxu3  ;;  %v676_v7 = vpop.f32.mrf.mxu0  ;;  %v3382_v56 = vld [vmem:[%s6067_s6 + $0x3f8] sm:$0xf]  ;;  %v3978_v57 = vld [vmem:[%s6067_s6 + $0x410] sm:$0xf0]  ;;  %v3551_v51 = vor.u32 %v4020_v43, %v3550_v42  ;;  %v3996_v53 = vld [vmem:[%s6067_s6 + $0x4a4] sm:$0xf] }
 0x1b5   :  { %v707_v12 = vmax.f32 %v701_v2, 0.0  ;;  %v3383_v2 = vor.u32 %v3978_v57, %v3382_v56  ;;  %v3354_v6 = vld [vmem:[%s6067_s6 + $0x3c0] sm:$0xf]  ;;  %v3971_v7 = vld [vmem:[%s6067_s6 + $0x3d8] sm:$0xf0]  ;;  %v3751_v56 = vor.u32 %v4066_v46, %v3748_v47 }
 0x1b6   :  { %2240 = vmatpush.bf16.msrb.mxu0 %v3215_v0  ;;  %v3634_v0 = vld [vmem:[%s6067_s6 + $0x5f0] sm:$0xf]  ;;  %v3355_v14 = vor.u32 %v3971_v7, %v3354_v6  ;;  %v3919_v57 = vld [vmem:[%s6067_s6 + $0x23c] sm:$0xf]  ;;  %v3082_v6 = vld [vmem:[%s6067_s6 + $0x198] sm:$0xf] }
 0x1b7   :  { %v5147_v19 = vpack.c.bf16 %v707_v12, %v707_v12  ;;  %v3606_v12 = vld [vmem:[%s6067_s6 + $0x5b8] sm:$0xf]  ;;  %v3902_v7 = vld [vmem:[%s6067_s6 + $0x1b0] sm:$0xf0]  ;;  %v3278_v42 = vld [vmem:[%s6067_s6 + $0x320] sm:$0xf] }
 0x1b8   :  { %2229 = vmatpush.bf16.msra.mxu3 %v2935_v8  ;;  %2251 = vmatpush.bf16.msrb.mxu1 %v3495_v9  ;;  %v3635_v8 = vor.u32 %v4041_v1, %v3634_v0  ;;  %v3877_v9 = vld [vmem:[%s6067_s6 + $0xec] sm:$0xf]  ;;  %v2880_v1 = vld [vmem:[%s6067_s6 + $0x24] sm:$0xf0]  ;;  %v3951_v43 = vld [vmem:[%s6067_s6 + $0x338] sm:$0xf0] }
 0x1b9   :  { %2167 = vmatmul.bf16.vlgmr.msrb.gmra.mxu2 %v5147_v19  ;;  %2193 = vmatmul.bf16.vlgmr.msra.gmra.mxu0 %v5065_v33  ;;  %v2995_v17 = vor.u32 %v3877_v9, %v2992_v10  ;;  %v3849_v0 = vld [vmem:[%s6067_s6 + $0xc] sm:$0xf]  ;;  %v3132_v9 = vld [vmem:[%s6067_s6 + $0x21c] sm:$0xf0]  ;;  %v4052_v10 = vld [vmem:[%s6067_s6 + $0x664] sm:$0xf] }
 0x1ba   :  { %2241 = vmatpush.bf16.msrb.mxu0 %v3187_v15  ;;  %2263 = vmatpush.bf16.msrb.mxu2 %v3747_v16  ;;  %v702_v29 = vpop.f32.mrf.mxu2  ;;  %v3940_v15 = vld [vmem:[%s6067_s6 + $0x2e4] sm:$0xf]  ;;  %v3244_v16 = vld [vmem:[%s6067_s6 + $0x2fc] sm:$0xf0] }
 0x1bb   :  { %v3247_v27 = vor.u32 %v3940_v15, %v3244_v16  ;;  %v4027_v29 = vld [vmem:[%s6067_s6 + $0x598] sm:$0xf0]  ;;  %v3982_v15 = vld [vmem:[%s6067_s6 + $0x434] sm:$0xf]  ;;  %v3412_v16 = vld [vmem:[%s6067_s6 + $0x44c] sm:$0xf0] }
 0x1bc   :  { %2230 = vmatpush.bf16.msra.mxu3 %v2907_v23  ;;  %2252 = vmatpush.bf16.msrb.mxu1 %v3467_v24  ;;  %v3607_v23 = vor.u32 %v4034_v13, %v3606_v12  ;;  %v2964_v24 = vld [vmem:[%s6067_s6 + $0xcc] sm:$0xf0]  ;;  %v3579_v37 = vor.u32 %v4027_v29, %v3578_v28  ;;  %v2883_v12 = vor.u32 %v3849_v0, %v2880_v1  ;;  %v3306_v28 = vld [vmem:[%s6067_s6 + $0x358] sm:$0xf]  ;;  %v3958_v29 = vld [vmem:[%s6067_s6 + $0x370] sm:$0xf0] }
 0x1bd   :  { %v2967_v34 = vor.u32 %v3870_v22, %v2964_v24  ;;  %v3895_v22 = vld [vmem:[%s6067_s6 + $0x178] sm:$0xf0]  ;;  %v3104_v24 = vld [vmem:[%s6067_s6 + $0x1e4] sm:$0xf0]  ;;  %v3307_v38 = vor.u32 %v3958_v29, %v3306_v28  ;;  %v3356_v46 = vld [vmem:[%s6067_s6 + $0x3dc] sm:$0xf0] }
 0x1be   :  { %2242 = vmatpush.bf16.msrb.mxu0 %v3159_v30  ;;  %2264 = vmatpush.bf16.msrb.mxu2 %v3719_v31  ;;  %v3327_v30 = vor.u32 %v3964_v21, %v3326_v20  ;;  %v3933_v31 = vld [vmem:[%s6067_s6 + $0x2ac] sm:$0xf]  ;;  %v3054_v21 = vld [vmem:[%s6067_s6 + $0x160] sm:$0xf]  ;;  %v4014_v0 = vld [vmem:[%s6067_s6 + $0x530] sm:$0xf0] }
 0x1c0   :  { %2231 = vmatpush.bf16.msra.mxu3 %v2879_v39  ;;  %2253 = vmatpush.bf16.msrb.mxu1 %v3439_v40  ;;  %v4003_v39 = vld [vmem:[%s6067_s6 + $0x4dc] sm:$0xf]  ;;  %v3496_v40 = vld [vmem:[%s6067_s6 + $0x4f4] sm:$0xf0] }
 0x1c1   :  { %v3499_v49 = vor.u32 %v4003_v39, %v3496_v40  ;;  %v4038_v39 = vld [vmem:[%s6067_s6 + $0x5f4] sm:$0xf]  ;;  %v3636_v40 = vld [vmem:[%s6067_s6 + $0x60c] sm:$0xf0] }
 0x1c2   :  { %2243 = vmatpush.bf16.msrb.mxu0 %v3131_v44  ;;  %2265 = vmatpush.bf16.msrb.mxu2 %v3691_v45  ;;  %v3926_v44 = vld [vmem:[%s6067_s6 + $0x274] sm:$0xf]  ;;  %v3188_v45 = vld [vmem:[%s6067_s6 + $0x28c] sm:$0xf0]  ;;  %v3639_v47 = vor.u32 %v4038_v39, %v3636_v40  ;;  %v3853_v40 = vld [vmem:[%s6067_s6 + $0x28] sm:$0xf0] }
 0x1c3   :  { %2206 = vmatmul.bf16.vlgmr.msra.gmra.mxu1 %v5107_v59  ;;  %2232 = vmatmul.bf16.vlgmr.msra.gmra.mxu3 %v5044_v18 }
 0x1c4   :  { %2276 = vmatpush.bf16.msrb.mxu3 %v3079_v41  ;;  %2254 = vmatpush.bf16.msrb.mxu1 %v3411_v52  ;;  %v3219_v41 = vor.u32 %v3933_v31, %v3216_v32  ;;  %v2908_v52 = vld [vmem:[%s6067_s6 + $0x5c] sm:$0xf0]  ;;  %v3975_v31 = vld [vmem:[%s6067_s6 + $0x3fc] sm:$0xf]  ;;  %v3384_v32 = vld [vmem:[%s6067_s6 + $0x414] sm:$0xf0] }
 0x1c5   :  { %v2911_v62 = vor.u32 %v3856_v50, %v2908_v52  ;;  %v3279_v50 = vor.u32 %v3951_v43, %v3278_v42  ;;  %v3608_v52 = vld [vmem:[%s6067_s6 + $0x5d4] sm:$0xf0]  ;;  %v3993_v42 = vld [vmem:[%s6067_s6 + $0x488] sm:$0xf0] }
 0x1c6   :  { %2244 = vmatpush.bf16.msrb.mxu0 %v3103_v58  ;;  %2266 = vmatpush.bf16.msrb.mxu2 %v3663_v60  ;;  %v3160_v58 = vld [vmem:[%s6067_s6 + $0x254] sm:$0xf0]  ;;  %v4059_v60 = vld [vmem:[%s6067_s6 + $0x69c] sm:$0xf] }
 0x1c7   :  { %v3163_v4 = vor.u32 %v3919_v57, %v3160_v58  ;;  %v3961_v57 = vld [vmem:[%s6067_s6 + $0x38c] sm:$0xf]  ;;  %v3328_v58 = vld [vmem:[%s6067_s6 + $0x3a4] sm:$0xf0] }
 0x1c8   :  { %2277 = vmatpush.bf16.msrb.mxu3 %v3051_v55  ;;  %2255 = vmatpush.bf16.msrb.mxu1 %v3383_v2  ;;  %v3191_v55 = vor.u32 %v3926_v44, %v3188_v45  ;;  %v3989_v2 = vld [vmem:[%s6067_s6 + $0x46c] sm:$0xf]  ;;  %v3968_v45 = vld [vmem:[%s6067_s6 + $0x3c4] sm:$0xf] }
 0x1c9   :  { %2219 = vmatmul.bf16.vlgmr.msra.gmra.mxu2 %v5147_v19  ;;  %2245 = vmatmul.bf16.vlgmr.msrb.gmra.mxu0 %v5065_v33  ;;  %v3443_v13 = vor.u32 %v3989_v2, %v3440_v3  ;;  %v4024_v2 = vld [vmem:[%s6067_s6 + $0x584] sm:$0xf]  ;;  %v3580_v3 = vld [vmem:[%s6067_s6 + $0x59c] sm:$0xf0] }
 0x1ca   :  { %2289 = vmatpush.bf16.msra.mxu0 %v3303_v63  ;;  %2267 = vmatpush.bf16.msrb.mxu2 %v3635_v8  ;;  %v3471_v63 = vor.u32 %v3996_v53, %v3468_v54  ;;  %v3912_v8 = vld [vmem:[%s6067_s6 + $0x204] sm:$0xf]  ;;  %v3359_v53 = vor.u32 %v3968_v45, %v3356_v46  ;;  %v3250_v54 = vld [vmem:[%s6067_s6 + $0x2e8] sm:$0xf]  ;;  %v3899_v45 = vld [vmem:[%s6067_s6 + $0x19c] sm:$0xf] }
 0x1cb   :  { %v3084_v46 = vld [vmem:[%s6067_s6 + $0x1b4] sm:$0xf0] }
 0x1cc   :  { %2278 = vmatpush.bf16.msrb.mxu3 %v3023_v5  ;;  %2256 = vmatpush.bf16.msrb.mxu1 %v3355_v14  ;;  %v3723_v5 = vor.u32 %v4059_v60, %v3720_v61  ;;  %v3083_v14 = vor.u32 %v3902_v7, %v3082_v6  ;;  %v2970_v60 = vld [vmem:[%s6067_s6 + $0xb8] sm:$0xf]  ;;  %v3937_v6 = vld [vmem:[%s6067_s6 + $0x2c8] sm:$0xf0] }
 0x1ce   :  { %2290 = vmatpush.bf16.msra.mxu0 %v3275_v11  ;;  %2268 = vmatpush.bf16.msrb.mxu2 %v3607_v23  ;;  %v3692_v11 = vld [vmem:[%s6067_s6 + $0x67c] sm:$0xf0]  ;;  %v3905_v23 = vld [vmem:[%s6067_s6 + $0x1cc] sm:$0xf] }
 0x1cf   :  { %v3695_v20 = vor.u32 %v4052_v10, %v3692_v11  ;;  %v3583_v10 = vor.u32 %v4024_v2, %v3580_v3  ;;  %v3867_v11 = vld [vmem:[%s6067_s6 + $0x98] sm:$0xf0]  ;;  %v3308_v2 = vld [vmem:[%s6067_s6 + $0x374] sm:$0xf0] }
 0x1d0   :  { %2279 = vmatpush.bf16.msrb.mxu3 %v2995_v17  ;;  %2257 = vmatpush.bf16.msrb.mxu1 %v3327_v30  ;;  %v3135_v17 = vor.u32 %v3912_v8, %v3132_v9  ;;  %v3055_v30 = vor.u32 %v3895_v22, %v3054_v21  ;;  %v2942_v9 = vld [vmem:[%s6067_s6 + $0x80] sm:$0xf]  ;;  %v3754_v21 = vld [vmem:[%s6067_s6 + $0x6d8] sm:$0xf]  ;;  %v4070_v22 = vld [vmem:[%s6067_s6 + $0x6f0] sm:$0xf0] }
 0x1d1   :  { %v3755_v29 = vor.u32 %v4070_v22, %v3754_v21  ;;  %v3362_v21 = vld [vmem:[%s6067_s6 + $0x3c8] sm:$0xf]  ;;  %v3972_v22 = vld [vmem:[%s6067_s6 + $0x3e0] sm:$0xf0] }
 0x1d2   :  { %2291 = vmatpush.bf16.msra.mxu0 %v3247_v27  ;;  %2269 = vmatpush.bf16.msrb.mxu2 %v3579_v37  ;;  %v3415_v27 = vor.u32 %v3982_v15, %v3412_v16  ;;  %v3888_v37 = vld [vmem:[%s6067_s6 + $0x140] sm:$0xf0]  ;;  %v4017_v15 = vld [vmem:[%s6067_s6 + $0x54c] sm:$0xf]  ;;  %v3552_v16 = vld [vmem:[%s6067_s6 + $0x564] sm:$0xf0] }
 0x1d3   :  { %2258 = vmatmul.bf16.vlgmr.msrb.gmra.mxu1 %v5107_v59  ;;  %v3027_v44 = vor.u32 %v3888_v37, %v3026_v36  ;;  %v4063_v36 = vld [vmem:[%s6067_s6 + $0x6b8] sm:$0xf0] }
 0x1d4   :  { %2280 = vmatpush.bf16.msrb.mxu3 %v2967_v34  ;;  %2302 = vmatpush.bf16.msra.mxu1 %v3527_v35  ;;  %v3107_v34 = vor.u32 %v3905_v23, %v3104_v24  ;;  %v3667_v35 = vor.u32 %v4045_v25, %v3664_v26  ;;  %v2943_v23 = vor.u32 %v3867_v11, %v2942_v9  ;;  %v2914_v26 = vld [vmem:[%s6067_s6 + $0x48] sm:$0xf]  ;;  %v3885_v9 = vld [vmem:[%s6067_s6 + $0x12c] sm:$0xf] }
 0x1d5   :  { %v3555_v25 = vor.u32 %v4017_v15, %v3552_v16  ;;  %v3028_v11 = vld [vmem:[%s6067_s6 + $0x144] sm:$0xf0]  ;;  %v3280_v15 = vld [vmem:[%s6067_s6 + $0x33c] sm:$0xf0] }
 0x1d6   :  { %2292 = vmatpush.bf16.msra.mxu0 %v3219_v41  ;;  %2270 = vmatpush.bf16.msrb.mxu2 %v3551_v51  ;;  %v3387_v41 = vor.u32 %v3975_v31, %v3384_v32  ;;  %v4031_v51 = vld [vmem:[%s6067_s6 + $0x5bc] sm:$0xf]  ;;  %v4000_v31 = vld [vmem:[%s6067_s6 + $0x4c0] sm:$0xf0]  ;;  %v3166_v32 = vld [vmem:[%s6067_s6 + $0x240] sm:$0xf] }
 0x1d7   :  { %v3611_v61 = vor.u32 %v4031_v51, %v3608_v52 }
 0x1d8   :  { %2281 = vmatpush.bf16.msrb.mxu3 %v2939_v48  ;;  %2303 = vmatpush.bf16.msra.mxu1 %v3499_v49  ;;  %v2998_v48 = vld [vmem:[%s6067_s6 + $0xf0] sm:$0xf]  ;;  %v3881_v49 = vld [vmem:[%s6067_s6 + $0x108] sm:$0xf0] }
 0x1d9   :  { %2271 = vmatmul.bf16.vlgmr.msrb.gmra.mxu2 %v5147_v19 }
 0x1da   :  { %2293 = vmatpush.bf16.msra.mxu0 %v3191_v55  ;;  %2315 = vmatpush.bf16.msra.mxu2 %v3751_v56  ;;  %v3944_v55 = vld [vmem:[%s6067_s6 + $0x300] sm:$0xf0]  ;;  %v2999_v56 = vor.u32 %v3881_v49, %v2998_v48  ;;  %v3698_v49 = vld [vmem:[%s6067_s6 + $0x668] sm:$0xf] }
 0x1db   :  { %v3251_v1 = vor.u32 %v3944_v55, %v3250_v54  ;;  %v3916_v48 = vld [vmem:[%s6067_s6 + $0x220] sm:$0xf0]  ;;  %v3418_v54 = vld [vmem:[%s6067_s6 + $0x438] sm:$0xf]  ;;  %v3986_v55 = vld [vmem:[%s6067_s6 + $0x450] sm:$0xf0] }
 0x1dc   :  { %2282 = vmatpush.bf16.msrb.mxu3 %v2911_v62  ;;  %2304 = vmatpush.bf16.msra.mxu1 %v3471_v63  ;;  %v3874_v62 = vld [vmem:[%s6067_s6 + $0xd0] sm:$0xf0]  ;;  %v3530_v63 = vld [vmem:[%s6067_s6 + $0x518] sm:$0xf]  ;;  %v3419_v3 = vor.u32 %v3986_v55, %v3418_v54  ;;  %v3558_v54 = vld [vmem:[%s6067_s6 + $0x550] sm:$0xf] }
 0x1dd   :  { %v2971_v7 = vor.u32 %v3874_v62, %v2970_v60  ;;  %v3531_v8 = vor.u32 %v4014_v0, %v3530_v63  ;;  %v3056_v60 = vld [vmem:[%s6067_s6 + $0x17c] sm:$0xf0]  ;;  %v3909_v62 = vld [vmem:[%s6067_s6 + $0x1e8] sm:$0xf0]  ;;  %v3670_v63 = vld [vmem:[%s6067_s6 + $0x630] sm:$0xf] }
 0x1de   :  { %2294 = vmatpush.bf16.msra.mxu0 %v3163_v4  ;;  %2316 = vmatpush.bf16.msra.mxu2 %v3723_v5  ;;  %v3331_v4 = vor.u32 %v3961_v57, %v3328_v58  ;;  %v3222_v5 = vld [vmem:[%s6067_s6 + $0x2b0] sm:$0xf]  ;;  %v3892_v58 = vld [vmem:[%s6067_s6 + $0x164] sm:$0xf]  ;;  %v4049_v0 = vld [vmem:[%s6067_s6 + $0x648] sm:$0xf0] }
 0x1df   :  { %v4021_v55 = vld [vmem:[%s6067_s6 + $0x568] sm:$0xf0] }
 0x1e0   :  { %2283 = vmatpush.bf16.msrb.mxu3 %v2883_v12  ;;  %2305 = vmatpush.bf16.msra.mxu1 %v3443_v13  ;;  %v3502_v12 = vld [vmem:[%s6067_s6 + $0x4e0] sm:$0xf]  ;;  %v4007_v13 = vld [vmem:[%s6067_s6 + $0x4f8] sm:$0xf0] }
 0x1e1   :  { %v3503_v24 = vor.u32 %v4007_v13, %v3502_v12  ;;  %v3642_v12 = vld [vmem:[%s6067_s6 + $0x5f8] sm:$0xf]  ;;  %v4042_v13 = vld [vmem:[%s6067_s6 + $0x610] sm:$0xf0] }
 0x1e2   :  { %2295 = vmatpush.bf16.msra.mxu0 %v3135_v17  ;;  %2317 = vmatpush.bf16.msra.mxu2 %v3695_v20  ;;  %v3194_v17 = vld [vmem:[%s6067_s6 + $0x278] sm:$0xf]  ;;  %v3930_v20 = vld [vmem:[%s6067_s6 + $0x290] sm:$0xf0] }
 0x1e3   :  { %2284 = vmatmul.bf16.vlgmr.msrb.gmra.mxu3 %v5044_v18  ;;  %v3195_v28 = vor.u32 %v3930_v20, %v3194_v17  ;;  %v3031_v17 = vor.u32 %v3885_v9, %v3028_v11  ;;  %v3643_v20 = vor.u32 %v4042_v13, %v3642_v12  ;;  %v3728_v9 = vld [vmem:[%s6067_s6 + $0x6bc] sm:$0xf0]  ;;  %v3850_v11 = vld [vmem:[%s6067_s6 + $0x14] sm:$0xf] }
 0x1e4   :  { %2328 = vmatpush.bf16.msra.mxu3 %v3083_v14  ;;  %2306 = vmatpush.bf16.msra.mxu1 %v3415_v27  ;;  %v3223_v14 = vor.u32 %v3937_v6, %v3222_v5  ;;  %v3860_v27 = vld [vmem:[%s6067_s6 + $0x60] sm:$0xf0]  ;;  %v3671_v6 = vor.u32 %v4049_v0, %v3670_v63  ;;  %v3559_v63 = vor.u32 %v4021_v55, %v3558_v54 }
 0x1e5   :  { %v2915_v37 = vor.u32 %v3860_v27, %v2914_v26  ;;  %v3614_v26 = vld [vmem:[%s6067_s6 + $0x5c0] sm:$0xf]  ;;  %v4035_v27 = vld [vmem:[%s6067_s6 + $0x5d8] sm:$0xf0]  ;;  %v3952_v54 = vld [vmem:[%s6067_s6 + $0x340] sm:$0xf0] }
 0x1e6   :  { %2296 = vmatpush.bf16.msra.mxu0 %v3107_v34  ;;  %2318 = vmatpush.bf16.msra.mxu2 %v3667_v35  ;;  %v3923_v34 = vld [vmem:[%s6067_s6 + $0x258] sm:$0xf0]  ;;  %v3726_v35 = vld [vmem:[%s6067_s6 + $0x6a0] sm:$0xf] }
 0x1e7   :  { %v3167_v43 = vor.u32 %v3923_v34, %v3166_v32  ;;  %v3615_v34 = vor.u32 %v4035_v27, %v3614_v26 }
 0x1e8   :  { %2329 = vmatpush.bf16.msra.mxu3 %v3055_v30  ;;  %2307 = vmatpush.bf16.msra.mxu1 %v3387_v41  ;;  %v3474_v30 = vld [vmem:[%s6067_s6 + $0x4a8] sm:$0xf]  ;;  %v3446_v41 = vld [vmem:[%s6067_s6 + $0x470] sm:$0xf] }
 0x1e9   :  { %2297 = vmatmul.bf16.vlgmr.msra.gmra.mxu0 %v5065_v33  ;;  %v3475_v39 = vor.u32 %v4000_v31, %v3474_v30  ;;  %v3447_v52 = vor.u32 %v3993_v42, %v3446_v41  ;;  %v3363_v30 = vor.u32 %v3972_v22, %v3362_v21  ;;  %v3334_v31 = vld [vmem:[%s6067_s6 + $0x390] sm:$0xf]  ;;  %v3586_v41 = vld [vmem:[%s6067_s6 + $0x588] sm:$0xf]  ;;  %v4028_v42 = vld [vmem:[%s6067_s6 + $0x5a0] sm:$0xf0] }
 0x1ea   :  { %2341 = vmatpush.bf16.msrb.mxu0 %v3307_v38  ;;  %2319 = vmatpush.bf16.msra.mxu2 %v3639_v47  ;;  %v2886_v38 = vld [vmem:[%s6067_s6 + $0x10] sm:$0xf]  ;;  %v3138_v47 = vld [vmem:[%s6067_s6 + $0x208] sm:$0xf]  ;;  %v3903_v21 = vld [vmem:[%s6067_s6 + $0x1b8] sm:$0xf0] }
 0x1eb   :  { %v2887_v51 = vor.u32 %v3853_v40, %v2886_v38  ;;  %v3532_v40 = vld [vmem:[%s6067_s6 + $0x534] sm:$0xf0]  ;;  %v3913_v22 = vld [vmem:[%s6067_s6 + $0x20c] sm:$0xf] }
 0x1ec   :  { %2330 = vmatpush.bf16.msra.mxu3 %v3027_v44  ;;  %2308 = vmatpush.bf16.msra.mxu1 %v3359_v53  ;;  %v3727_v44 = vor.u32 %v4063_v36, %v3726_v35  ;;  %v3087_v53 = vor.u32 %v3899_v45, %v3084_v46  ;;  %v3965_v35 = vld [vmem:[%s6067_s6 + $0x3a8] sm:$0xf0]  ;;  %v3871_v36 = vld [vmem:[%s6067_s6 + $0xbc] sm:$0xf] }
 0x1ed   :  { %v3335_v45 = vor.u32 %v3965_v35, %v3334_v31  ;;  %v3896_v35 = vld [vmem:[%s6067_s6 + $0x180] sm:$0xf0] }
 0x1ee   :  { %2342 = vmatpush.bf16.msrb.mxu0 %v3279_v50  ;;  %2320 = vmatpush.bf16.msra.mxu2 %v3611_v61  ;;  %v4056_v50 = vld [vmem:[%s6067_s6 + $0x680] sm:$0xf0]  ;;  %v3110_v61 = vld [vmem:[%s6067_s6 + $0x1d0] sm:$0xf] }
 0x1ef   :  { %v3699_v57 = vor.u32 %v4056_v50, %v3698_v49  ;;  %v3111_v5 = vor.u32 %v3909_v62, %v3110_v61  ;;  %v2944_v49 = vld [vmem:[%s6067_s6 + $0x9c] sm:$0xf0]  ;;  %v3587_v50 = vor.u32 %v4028_v42, %v3586_v41  ;;  %v3959_v41 = vld [vmem:[%s6067_s6 + $0x378] sm:$0xf0] }
 0x1f0   :  { %2331 = vmatpush.bf16.msra.mxu3 %v2999_v56  ;;  %2309 = vmatpush.bf16.msra.mxu1 %v3331_v4  ;;  %v3139_v56 = vor.u32 %v3916_v48, %v3138_v47  ;;  %v3059_v4 = vor.u32 %v3892_v58, %v3056_v60  ;;  %v3864_v48 = vld [vmem:[%s6067_s6 + $0x84] sm:$0xf]  ;;  %v4067_v58 = vld [vmem:[%s6067_s6 + $0x6dc] sm:$0xf]  ;;  %v3756_v60 = vld [vmem:[%s6067_s6 + $0x6f4] sm:$0xf0] }
 0x1f1   :  { %v2947_v61 = vor.u32 %v3864_v48, %v2944_v49  ;;  %v3034_v48 = vld [vmem:[%s6067_s6 + $0x130] sm:$0xf] }
 0x1f2   :  { %2343 = vmatpush.bf16.msrb.mxu0 %v3251_v1  ;;  %2321 = vmatpush.bf16.msra.mxu2 %v3583_v10  ;;  %v3955_v1 = vld [vmem:[%s6067_s6 + $0x35c] sm:$0xf] }
 0x1f3   :  { %2310 = vmatmul.bf16.vlgmr.msra.gmra.mxu1 %v5107_v59  ;;  %v3311_v10 = vor.u32 %v3955_v1, %v3308_v2  ;;  %v3857_v1 = vld [vmem:[%s6067_s6 + $0x4c] sm:$0xf]  ;;  %v2916_v2 = vld [vmem:[%s6067_s6 + $0x64] sm:$0xf0] }
 0x1f4   :  { %2332 = vmatpush.bf16.msra.mxu3 %v2971_v7  ;;  %2354 = vmatpush.bf16.msrb.mxu1 %v3531_v8  ;;  %v3390_v7 = vld [vmem:[%s6067_s6 + $0x400] sm:$0xf]  ;;  %v3979_v8 = vld [vmem:[%s6067_s6 + $0x418] sm:$0xf0] }
 0x1f5   :  { %v3391_v16 = vor.u32 %v3979_v8, %v3390_v7  ;;  %v3168_v7 = vld [vmem:[%s6067_s6 + $0x25c] sm:$0xf0]  ;;  %v4060_v8 = vld [vmem:[%s6067_s6 + $0x6a4] sm:$0xf] }
 0x1f6   :  { %2344 = vmatpush.bf16.msrb.mxu0 %v3223_v14  ;;  %2322 = vmatpush.bf16.msra.mxu2 %v3555_v25  ;;  %v3948_v14 = vld [vmem:[%s6067_s6 + $0x324] sm:$0xf]  ;;  %v3000_v25 = vld [vmem:[%s6067_s6 + $0x10c] sm:$0xf0] }
 0x1f8   :  { %2333 = vmatpush.bf16.msra.mxu3 %v2943_v23  ;;  %2355 = vmatpush.bf16.msrb.mxu1 %v3503_v24  ;;  %v3878_v23 = vld [vmem:[%s6067_s6 + $0xf4] sm:$0xf]  ;;  %v3283_v24 = vor.u32 %v3948_v14, %v3280_v15  ;;  %v2888_v14 = vld [vmem:[%s6067_s6 + $0x2c] sm:$0xf0] }
 0x1f9   :  { %2323 = vmatmul.bf16.vlgmr.msra.gmra.mxu2 %v5147_v19  ;;  %v3003_v32 = vor.u32 %v3878_v23, %v3000_v25  ;;  %v3990_v15 = vld [vmem:[%s6067_s6 + $0x474] sm:$0xf]  ;;  %v3140_v23 = vld [vmem:[%s6067_s6 + $0x224] sm:$0xf0]  ;;  %v2891_v26 = vor.u32 %v3850_v11, %v2888_v14  ;;  %v4025_v14 = vld [vmem:[%s6067_s6 + $0x58c] sm:$0xf] }
 0x1fa   :  { %2345 = vmatpush.bf16.msrb.mxu0 %v3195_v28  ;;  %2367 = vmatpush.bf16.msrb.mxu2 %v3755_v29  ;;  %v3941_v28 = vld [vmem:[%s6067_s6 + $0x2ec] sm:$0xf]  ;;  %v3252_v29 = vld [vmem:[%s6067_s6 + $0x304] sm:$0xf0]  ;;  %v3143_v31 = vor.u32 %v3913_v22, %v3140_v23 }
 0x1fb   :  { %v3255_v38 = vor.u32 %v3941_v28, %v3252_v29  ;;  %v3700_v25 = vld [vmem:[%s6067_s6 + $0x684] sm:$0xf0]  ;;  %v3983_v29 = vld [vmem:[%s6067_s6 + $0x43c] sm:$0xf] }
 0x1fc   :  { %2334 = vmatpush.bf16.msra.mxu3 %v2915_v37  ;;  %2356 = vmatpush.bf16.msrb.mxu1 %v3475_v39  ;;  %v2972_v37 = vld [vmem:[%s6067_s6 + $0xd4] sm:$0xf0]  ;;  %v4011_v39 = vld [vmem:[%s6067_s6 + $0x51c] sm:$0xf] }
 0x1fd   :  { %v2975_v46 = vor.u32 %v3871_v36, %v2972_v37  ;;  %v3535_v47 = vor.u32 %v4011_v39, %v3532_v40  ;;  %v3906_v36 = vld [vmem:[%s6067_s6 + $0x1d4] sm:$0xf]  ;;  %v3112_v37 = vld [vmem:[%s6067_s6 + $0x1ec] sm:$0xf0]  ;;  %v3314_v40 = vld [vmem:[%s6067_s6 + $0x360] sm:$0xf] }
 0x1fe   :  { %2346 = vmatpush.bf16.msrb.mxu0 %v3167_v43  ;;  %2368 = vmatpush.bf16.msrb.mxu2 %v3727_v44  ;;  %v3934_v43 = vld [vmem:[%s6067_s6 + $0x2b4] sm:$0xf]  ;;  %v3224_v44 = vld [vmem:[%s6067_s6 + $0x2cc] sm:$0xf0]  ;;  %v3315_v49 = vor.u32 %v3959_v41, %v3314_v40 }
 0x1ff   :  { %v3672_v39 = vld [vmem:[%s6067_s6 + $0x64c] sm:$0xf0] }
 0x200   :  { %2335 = vmatpush.bf16.msra.mxu3 %v2887_v51  ;;  %2357 = vmatpush.bf16.msrb.mxu1 %v3447_v52  ;;  %v3227_v51 = vor.u32 %v3934_v43, %v3224_v44  ;;  %v4004_v52 = vld [vmem:[%s6067_s6 + $0x4e4] sm:$0xf]  ;;  %v3115_v44 = vor.u32 %v3906_v36, %v3112_v37  ;;  %v3762_v36 = vld [vmem:[%s6067_s6 + $0x6e0] sm:$0xf]  ;;  %v4071_v37 = vld [vmem:[%s6067_s6 + $0x6f8] sm:$0xf0] }
 0x202   :  { %2347 = vmatpush.bf16.msrb.mxu0 %v3139_v56  ;;  %2369 = vmatpush.bf16.msrb.mxu2 %v3699_v57  ;;  %v3927_v56 = vld [vmem:[%s6067_s6 + $0x27c] sm:$0xf]  ;;  %v3196_v57 = vld [vmem:[%s6067_s6 + $0x294] sm:$0xf0] }
 0x203   :  { %2336 = vmatmul.bf16.vlgmr.msra.gmra.mxu3 %v5044_v18  ;;  %v3199_v0 = vor.u32 %v3927_v56, %v3196_v57 }
 0x204   :  { %2380 = vmatpush.bf16.msrb.mxu3 %v3087_v53  ;;  %2358 = vmatpush.bf16.msrb.mxu1 %v3419_v3  ;;  %v3504_v53 = vld [vmem:[%s6067_s6 + $0x4fc] sm:$0xf0]  ;;  %v3997_v3 = vld [vmem:[%s6067_s6 + $0x4ac] sm:$0xf] }
 0x205   :  { %v3507_v62 = vor.u32 %v4004_v52, %v3504_v53  ;;  %v3644_v52 = vld [vmem:[%s6067_s6 + $0x614] sm:$0xf0]  ;;  %v3286_v53 = vld [vmem:[%s6067_s6 + $0x328] sm:$0xf] }
 0x206   :  { %2348 = vmatpush.bf16.msrb.mxu0 %v3111_v5  ;;  %2370 = vmatpush.bf16.msrb.mxu2 %v3671_v6  ;;  %v3476_v5 = vld [vmem:[%s6067_s6 + $0x4c4] sm:$0xf0]  ;;  %v3920_v6 = vld [vmem:[%s6067_s6 + $0x244] sm:$0xf] }
 0x207   :  { %v3479_v12 = vor.u32 %v3997_v3, %v3476_v5  ;;  %v3171_v13 = vor.u32 %v3920_v6, %v3168_v7  ;;  %v3945_v3 = vld [vmem:[%s6067_s6 + $0x308] sm:$0xf0]  ;;  %v3962_v5 = vld [vmem:[%s6067_s6 + $0x394] sm:$0xf] }
 0x208   :  { %2381 = vmatpush.bf16.msrb.mxu3 %v3059_v4  ;;  %2359 = vmatpush.bf16.msrb.mxu1 %v3391_v16  ;;  %v3759_v4 = vor.u32 %v4067_v58, %v3756_v60  ;;  %v3448_v16 = vld [vmem:[%s6067_s6 + $0x48c] sm:$0xf0]  ;;  %v3969_v58 = vld [vmem:[%s6067_s6 + $0x3cc] sm:$0xf]  ;;  %v3364_v60 = vld [vmem:[%s6067_s6 + $0x3e4] sm:$0xf0] }
 0x209   :  { %2349 = vmatmul.bf16.vlgmr.msrb.gmra.mxu0 %v5065_v33  ;;  %v3451_v27 = vor.u32 %v3990_v15, %v3448_v16  ;;  %v3588_v15 = vld [vmem:[%s6067_s6 + $0x5a4] sm:$0xf0]  ;;  %v3230_v16 = vld [vmem:[%s6067_s6 + $0x2b8] sm:$0xf] }
 0x20a   :  { %2393 = vmatpush.bf16.msra.mxu0 %v3311_v10  ;;  %2371 = vmatpush.bf16.msrb.mxu2 %v3643_v20  ;;  %v2919_v10 = vor.u32 %v3857_v1, %v2916_v2  ;;  %v3090_v20 = vld [vmem:[%s6067_s6 + $0x1a0] sm:$0xf]  ;;  %v3258_v2 = vld [vmem:[%s6067_s6 + $0x2f0] sm:$0xf] }
 0x20b   :  { %v3091_v28 = vor.u32 %v3903_v21, %v3090_v20  ;;  %v3616_v1 = vld [vmem:[%s6067_s6 + $0x5dc] sm:$0xf0]  ;;  %v3259_v11 = vor.u32 %v3945_v3, %v3258_v2  ;;  %v4057_v2 = vld [vmem:[%s6067_s6 + $0x688] sm:$0xf0] }
 0x20c   :  { %2382 = vmatpush.bf16.msrb.mxu3 %v3031_v17  ;;  %2360 = vmatpush.bf16.msrb.mxu1 %v3363_v30  ;;  %v3731_v17 = vor.u32 %v4060_v8, %v3728_v9  ;;  %v3420_v30 = vld [vmem:[%s6067_s6 + $0x454] sm:$0xf0]  ;;  %v3336_v8 = vld [vmem:[%s6067_s6 + $0x3ac] sm:$0xf0]  ;;  %v2978_v9 = vld [vmem:[%s6067_s6 + $0xc0] sm:$0xf] }
 0x20d   :  { %v3423_v42 = vor.u32 %v3983_v29, %v3420_v30  ;;  %v3339_v20 = vor.u32 %v3962_v5, %v3336_v8  ;;  %v3510_v29 = vld [vmem:[%s6067_s6 + $0x4e8] sm:$0xf]  ;;  %v4008_v30 = vld [vmem:[%s6067_s6 + $0x500] sm:$0xf0]  ;;  %v3987_v8 = vld [vmem:[%s6067_s6 + $0x458] sm:$0xf0] }
 0x20e   :  { %2394 = vmatpush.bf16.msra.mxu0 %v3283_v24  ;;  %2372 = vmatpush.bf16.msrb.mxu2 %v3615_v34  ;;  %v4053_v24 = vld [vmem:[%s6067_s6 + $0x66c] sm:$0xf]  ;;  %v3062_v34 = vld [vmem:[%s6067_s6 + $0x168] sm:$0xf] }
 0x20f   :  { %v3063_v43 = vor.u32 %v3896_v35, %v3062_v34  ;;  %v3202_v34 = vld [vmem:[%s6067_s6 + $0x280] sm:$0xf]  ;;  %v3931_v35 = vld [vmem:[%s6067_s6 + $0x298] sm:$0xf0] }
 0x210   :  { %2383 = vmatpush.bf16.msrb.mxu3 %v3003_v32  ;;  %2361 = vmatpush.bf16.msrb.mxu1 %v3335_v45  ;;  %v3703_v32 = vor.u32 %v4053_v24, %v3700_v25  ;;  %v2950_v25 = vld [vmem:[%s6067_s6 + $0x88] sm:$0xf]  ;;  %v3203_v41 = vor.u32 %v3931_v35, %v3202_v34  ;;  %v4036_v34 = vld [vmem:[%s6067_s6 + $0x5e0] sm:$0xf0] }
 0x212   :  { %2395 = vmatpush.bf16.msra.mxu0 %v3255_v38  ;;  %2373 = vmatpush.bf16.msrb.mxu2 %v3587_v50  ;;  %v4046_v38 = vld [vmem:[%s6067_s6 + $0x634] sm:$0xf]  ;;  %v3889_v50 = vld [vmem:[%s6067_s6 + $0x148] sm:$0xf0] }
 0x213   :  { %2362 = vmatmul.bf16.vlgmr.msrb.gmra.mxu1 %v5107_v59  ;;  %v3675_v45 = vor.u32 %v4046_v38, %v3672_v39  ;;  %v3035_v56 = vor.u32 %v3889_v50, %v3034_v48  ;;  %v3511_v39 = vor.u32 %v4008_v30, %v3510_v29  ;;  %v3924_v48 = vld [vmem:[%s6067_s6 + $0x260] sm:$0xf0] }
 0x214   :  { %2384 = vmatpush.bf16.msrb.mxu3 %v2975_v46  ;;  %2406 = vmatpush.bf16.msra.mxu1 %v3535_v47  ;;  %v3976_v46 = vld [vmem:[%s6067_s6 + $0x404] sm:$0xf]  ;;  %v3392_v47 = vld [vmem:[%s6067_s6 + $0x41c] sm:$0xf0] }
 0x215   :  { %v3395_v55 = vor.u32 %v3976_v46, %v3392_v47  ;;  %v4001_v46 = vld [vmem:[%s6067_s6 + $0x4c8] sm:$0xf0]  ;;  %v3174_v47 = vld [vmem:[%s6067_s6 + $0x248] sm:$0xf]  ;;  %v4064_v50 = vld [vmem:[%s6067_s6 + $0x6c0] sm:$0xf0] }
 0x216   :  { %2396 = vmatpush.bf16.msra.mxu0 %v3227_v51  ;;  %2374 = vmatpush.bf16.msrb.mxu2 %v3559_v63  ;;  %v4039_v51 = vld [vmem:[%s6067_s6 + $0x5fc] sm:$0xf]  ;;  %v3882_v63 = vld [vmem:[%s6067_s6 + $0x110] sm:$0xf0] }
 0x217   :  { %v3647_v57 = vor.u32 %v4039_v51, %v3644_v52 }
 0x218   :  { %2385 = vmatpush.bf16.msrb.mxu3 %v2947_v61  ;;  %2407 = vmatpush.bf16.msra.mxu1 %v3507_v62  ;;  %v3006_v61 = vld [vmem:[%s6067_s6 + $0xf8] sm:$0xf]  ;;  %v3287_v62 = vor.u32 %v3952_v54, %v3286_v53 }
 0x219   :  { %2375 = vmatmul.bf16.vlgmr.msrb.gmra.mxu2 %v5147_v19  ;;  %v3007_v6 = vor.u32 %v3882_v63, %v3006_v61  ;;  %v3146_v63 = vld [vmem:[%s6067_s6 + $0x210] sm:$0xf] }
 0x21a   :  { %2397 = vmatpush.bf16.msra.mxu0 %v3199_v0  ;;  %2419 = vmatpush.bf16.msra.mxu2 %v3759_v4  ;;  %v4032_v0 = vld [vmem:[%s6067_s6 + $0x5c4] sm:$0xf]  ;;  %v3367_v4 = vor.u32 %v3969_v58, %v3364_v60  ;;  %v3454_v58 = vld [vmem:[%s6067_s6 + $0x478] sm:$0xf] }
 0x21b   :  { %v3619_v7 = vor.u32 %v4032_v0, %v3616_v1  ;;  %v3917_v0 = vld [vmem:[%s6067_s6 + $0x228] sm:$0xf0]  ;;  %v3706_v1 = vld [vmem:[%s6067_s6 + $0x670] sm:$0xf] }
 0x21c   :  { %2386 = vmatpush.bf16.msrb.mxu3 %v2919_v10  ;;  %2408 = vmatpush.bf16.msra.mxu1 %v3479_v12  ;;  %v3875_v10 = vld [vmem:[%s6067_s6 + $0xd8] sm:$0xf0]  ;;  %v3538_v12 = vld [vmem:[%s6067_s6 + $0x520] sm:$0xf]  ;;  %v3147_v5 = vor.u32 %v3917_v0, %v3146_v63 }
 0x21d   :  { %v2979_v23 = vor.u32 %v3875_v10, %v2978_v9  ;;  %v3118_v9 = vld [vmem:[%s6067_s6 + $0x1d8] sm:$0xf]  ;;  %v3910_v10 = vld [vmem:[%s6067_s6 + $0x1f0] sm:$0xf0] }
 0x21e   :  { %2398 = vmatpush.bf16.msra.mxu0 %v3171_v13  ;;  %2420 = vmatpush.bf16.msra.mxu2 %v3731_v17  ;;  %v4015_v13 = vld [vmem:[%s6067_s6 + $0x538] sm:$0xf0]  ;;  %v3938_v17 = vld [vmem:[%s6067_s6 + $0x2d0] sm:$0xf0] }
 0x21f   :  { %v3539_v24 = vor.u32 %v4015_v13, %v3538_v12  ;;  %v4050_v12 = vld [vmem:[%s6067_s6 + $0x650] sm:$0xf0] }
 0x220   :  { %2387 = vmatpush.bf16.msrb.mxu3 %v2891_v26  ;;  %2409 = vmatpush.bf16.msra.mxu1 %v3451_v27  ;;  %v3868_v26 = vld [vmem:[%s6067_s6 + $0xa0] sm:$0xf0]  ;;  %v3591_v27 = vor.u32 %v4025_v14, %v3588_v15 }
 0x221   :  { %v2951_v38 = vor.u32 %v3868_v26, %v2950_v25  ;;  %v3650_v26 = vld [vmem:[%s6067_s6 + $0x600] sm:$0xf] }
 0x222   :  { %2399 = vmatpush.bf16.msra.mxu0 %v3143_v31  ;;  %2421 = vmatpush.bf16.msra.mxu2 %v3703_v32  ;;  %v4018_v31 = vld [vmem:[%s6067_s6 + $0x554] sm:$0xf]  ;;  %v3560_v32 = vld [vmem:[%s6067_s6 + $0x56c] sm:$0xf0] }
 0x223   :  { %2388 = vmatmul.bf16.vlgmr.msrb.gmra.mxu3 %v5044_v18  ;;  %v3563_v40 = vor.u32 %v4018_v31, %v3560_v32  ;;  %v3622_v32 = vld [vmem:[%s6067_s6 + $0x5c8] sm:$0xf] }
 0x224   :  { %2432 = vmatpush.bf16.msra.mxu3 %v3091_v28  ;;  %2410 = vmatpush.bf16.msra.mxu1 %v3423_v42  ;;  %v3231_v28 = vor.u32 %v3938_v17, %v3230_v16  ;;  %v2922_v42 = vld [vmem:[%s6067_s6 + $0x50] sm:$0xf]  ;;  %v3119_v16 = vor.u32 %v3910_v10, %v3118_v9 }
 0x226   :  { %2400 = vmatpush.bf16.msra.mxu0 %v3115_v44  ;;  %2422 = vmatpush.bf16.msra.mxu2 %v3675_v45  ;;  %v5890_v21 = vpop.f32.mrf.mxu3  ;;  %v5892_v22 = vpop.f32.mrf.mxu0  ;;  %v3482_v44 = vld [vmem:[%s6067_s6 + $0x4b0] sm:$0xf]  ;;  %v3763_v45 = vor.u32 %v4071_v37, %v3762_v36 }
 0x227   :  { %v3483_v54 = vor.u32 %v4001_v46, %v3482_v44  ;;  %v2143_v25 = vadd.f32 %v5892_v22, %v5890_v21  ;;  %v3370_v21 = vld [vmem:[%s6067_s6 + $0x3d0] sm:$0xf]  ;;  %v4029_v44 = vld [vmem:[%s6067_s6 + $0x5a8] sm:$0xf0] }
 0x228   :  { %2433 = vmatpush.bf16.msra.mxu3 %v3063_v43  ;;  %2411 = vmatpush.bf16.msra.mxu1 %v3395_v55  ;;  %v3861_v43 = vld [vmem:[%s6067_s6 + $0x68] sm:$0xf0]  ;;  %v3175_v55 = vor.u32 %v3924_v48, %v3174_v47  ;;  %v3566_v48 = vld [vmem:[%s6067_s6 + $0x558] sm:$0xf] }
 0x229   :  { %2401 = vmatmul.bf16.vlgmr.msra.gmra.mxu0 %v5065_v33  ;;  %v2923_v53 = vor.u32 %v3861_v43, %v2922_v42  ;;  %v3966_v42 = vld [vmem:[%s6067_s6 + $0x3b0] sm:$0xf0] }
 0x22a   :  { %2445 = vmatpush.bf16.msrb.mxu0 %v3315_v49  ;;  %2423 = vmatpush.bf16.msra.mxu2 %v3647_v57  ;;  %v3734_v49 = vld [vmem:[%s6067_s6 + $0x6a8] sm:$0xf]  ;;  %v3854_v57 = vld [vmem:[%s6067_s6 + $0x30] sm:$0xf0] }
 0x22b   :  { %v3735_v61 = vor.u32 %v4064_v50, %v3734_v49  ;;  %v4022_v49 = vld [vmem:[%s6067_s6 + $0x570] sm:$0xf0] }
 0x22c   :  { %2434 = vmatpush.bf16.msra.mxu3 %v3035_v56  ;;  %2412 = vmatpush.bf16.msra.mxu1 %v3367_v4  ;;  %v2894_v56 = vld [vmem:[%s6067_s6 + $0x18] sm:$0xf] }
 0x22d   :  { %v2895_v3 = vor.u32 %v3854_v57, %v2894_v56 }
 0x22e   :  { %2446 = vmatpush.bf16.msrb.mxu0 %v3287_v62  ;;  %2424 = vmatpush.bf16.msra.mxu2 %v3619_v7  ;;  %v2131_v51 = vpop.f32.mrf.mxu3  ;;  %v2144_v52 = vpop.f32.mrf.mxu0  ;;  %v3994_v62 = vld [vmem:[%s6067_s6 + $0x490] sm:$0xf0]  ;;  %v3707_v7 = vor.u32 %v4057_v2, %v3706_v1 }
 0x22f   :  { %v3455_v4 = vor.u32 %v3994_v62, %v3454_v58 }
 0x230   :  { %2435 = vmatpush.bf16.msra.mxu3 %v3007_v6  ;;  %2413 = vmatpush.bf16.msra.mxu1 %v3339_v20  ;;  %v2155_v60 = vpop.f32.mrf.mxu1  ;;  %v3426_v6 = vld [vmem:[%s6067_s6 + $0x440] sm:$0xf] }
 0x231   :  { %v3427_v15 = vor.u32 %v3987_v8, %v3426_v6 }
 0x232   :  { %2447 = vmatpush.bf16.msrb.mxu0 %v3259_v11  ;;  %2425 = vmatpush.bf16.msra.mxu2 %v3591_v27  ;;  %v3678_v11 = vld [vmem:[%s6067_s6 + $0x638] sm:$0xf]  ;;  %v4043_v27 = vld [vmem:[%s6067_s6 + $0x618] sm:$0xf0] }
 0x233   :  { %2414 = vmatmul.bf16.vlgmr.msra.gmra.mxu1 %v5107_v59  ;;  %v3679_v20 = vor.u32 %v4050_v12, %v3678_v11  ;;  %v3651_v31 = vor.u32 %v4043_v27, %v3650_v26 }
 0x234   :  { %2436 = vmatpush.bf16.msra.mxu3 %v2979_v23  ;;  %2458 = vmatpush.bf16.msrb.mxu1 %v3539_v24  ;;  %v3398_v23 = vld [vmem:[%s6067_s6 + $0x408] sm:$0xf]  ;;  %v3980_v24 = vld [vmem:[%s6067_s6 + $0x420] sm:$0xf0] }
 0x235   :  { %v3399_v29 = vor.u32 %v3980_v24, %v3398_v23 }
 0x236   :  { %2448 = vmatpush.bf16.msrb.mxu0 %v3231_v28  ;;  %2426 = vmatpush.bf16.msra.mxu2 %v3563_v40  ;;  %v2181_v13 = vpop.f32.mrf.mxu3  ;;  %v2194_v14 = vpop.f32.mrf.mxu0  ;;  %v2156_v28 = vadd.f32 %v2155_v60, %v2143_v25  ;;  %v3623_v40 = vor.u32 %v4036_v34, %v3622_v32 }
 0x238   :  { %2437 = vmatpush.bf16.msra.mxu3 %v2951_v38  ;;  %2459 = vmatpush.bf16.msrb.mxu1 %v3511_v39  ;;  %v2157_v17 = vpop.f32.mrf.mxu1 }
 0x239   :  { %2427 = vmatmul.bf16.vlgmr.msra.gmra.mxu2 %v5147_v19 }
 0x23a   :  { %2449 = vmatpush.bf16.msrb.mxu0 %v3203_v41  ;;  %2471 = vmatpush.bf16.msrb.mxu2 %v3763_v45  ;;  %v3342_v41 = vld [vmem:[%s6067_s6 + $0x398] sm:$0xf] }
 0x23b   :  { %v3343_v45 = vor.u32 %v3966_v42, %v3342_v41 }
 0x23c   :  { %2438 = vmatpush.bf16.msra.mxu3 %v2923_v53  ;;  %2460 = vmatpush.bf16.msrb.mxu1 %v3483_v54  ;;  %v2168_v30 = vpop.f32.mrf.mxu2  ;;  %v3567_v53 = vor.u32 %v4022_v49, %v3566_v48 }
 0x23d   :  { %v2169_v22 = vadd.f32 %v2168_v30, %v2156_v28 }
 0x23e   :  { %2450 = vmatpush.bf16.msrb.mxu0 %v3175_v55  ;;  %2472 = vmatpush.bf16.msrb.mxu2 %v3735_v61  ;;  %v2183_v35 = vpop.f32.mrf.mxu3  ;;  %v2196_v36 = vpop.f32.mrf.mxu0  ;;  %v2195_v55 = vadd.f32 %v2194_v14, %v2181_v13 }
 0x23f   :  { %v2484_v37 = vsub.f32 0.0, %v2169_v22 }
 0x240   :  { %2439 = vmatpush.bf16.msra.mxu3 %v2895_v3  ;;  %2461 = vmatpush.bf16.msrb.mxu1 %v3455_v4  ;;  %v2207_v39 = vpop.f32.mrf.mxu1 }
 0x241   :  { %v2491_v43 = vmul.f32 1.442695, %v2484_v37  ;;  %v2208_v57 = vadd.f32 %v2207_v39, %v2195_v55 }
 0x242   :  { %2451 = vmatpush.bf16.msrb.mxu0 %v3147_v5  ;;  %2473 = vmatpush.bf16.msrb.mxu2 %v3707_v7 }
 0x243   :  { %2440 = vmatmul.bf16.vlgmr.msra.gmra.mxu3 %v5044_v18  ;;  %v3973_v18 = vld [vmem:[%s6067_s6 + $0x3e8] sm:$0xf0]  ;;  %4073 = vpow2.f32 %v2491_v43 }
 0x244   :  { %2462 = vmatpush.bf16.msrb.mxu1 %v3427_v15  ;;  %v3371_v38 = vor.u32 %v3973_v18, %v3370_v21  ;;  %v2170_v46 = vpop.f32.mrf.mxu2 }
 0x246   :  { %2452 = vmatpush.bf16.msrb.mxu0 %v3119_v16  ;;  %2474 = vmatpush.bf16.msrb.mxu2 %v3679_v20  ;;  %v2233_v50 = vpop.f32.mrf.mxu3  ;;  %v2246_v51 = vpop.f32.mrf.mxu0 }
 0x247   :  { %v2247_v5 = vadd.f32 %v2246_v51, %v2233_v50 }
 0x248   :  { %2463 = vmatpush.bf16.msrb.mxu1 %v3399_v29  ;;  %v2209_v52 = vpop.f32.mrf.mxu1 }
 0x249   :  { %2453 = vmatmul.bf16.vlgmr.msrb.gmra.mxu0 %v5065_v33  ;;  %v3594_v33 = vld [vmem:[%s6067_s6 + $0x590] sm:$0xf]  ;;  %v4074_v54 = vpop.eup %4073 }
 0x24a   :  { %2475 = vmatpush.bf16.msrb.mxu2 %v3651_v31  ;;  %v3595_v47 = vor.u32 %v4029_v44, %v3594_v33  ;;  %v2505_v56 = vadd.f32 1.0, %v4074_v54 }
 0x24c   :  { %2464 = vmatpush.bf16.msrb.mxu1 %v3371_v38  ;;  %4075 = vrcp.f32 %v2505_v56  ;;  %v2220_v58 = vpop.f32.mrf.mxu2 }
 0x24d   :  { %v2221_v60 = vadd.f32 %v2220_v58, %v2208_v57 }
 0x24e   :  { %2476 = vmatpush.bf16.msrb.mxu2 %v3623_v40  ;;  %v2235_v61 = vpop.f32.mrf.mxu3  ;;  %v2248_v63 = vpop.f32.mrf.mxu0 }
 0x24f   :  { %v2485_v62 = vsub.f32 0.0, %v2221_v60 }
 0x250   :  { %2465 = vmatpush.bf16.msrb.mxu1 %v3343_v45  ;;  %v2259_v0 = vpop.f32.mrf.mxu1 }
 0x251   :  { %v2493_v1 = vmul.f32 1.442695, %v2485_v62  ;;  %v2260_v7 = vadd.f32 %v2259_v0, %v2247_v5 }
 0x252   :  { %2477 = vmatpush.bf16.msrb.mxu2 %v3595_v47  ;;  %v4076_v2 = vpop.eup %4075 }
 0x253   :  { %2466 = vmatmul.bf16.vlgmr.msrb.gmra.mxu1 %v5107_v59  ;;  %2519 = vst [vmem:[%s6068_s7] sm:$0xff] %v4076_v2  ;;  %4077 = vpow2.f32 %v2493_v1 }
 0x254   :  { %v2222_v3 = vpop.f32.mrf.mxu2 }
 0x256   :  { %2478 = vmatpush.bf16.msrb.mxu2 %v3567_v53 }
 0x258   :  { %v2261_v59 = vpop.f32.mrf.mxu1 }
 0x259   :  { %2479 = vmatmul.bf16.vlgmr.msrb.gmra.mxu2 %v5147_v19  ;;  %v4078_v4 = vpop.eup %4077 }
 0x25a   :  { %v2506_v6 = vadd.f32 1.0, %v4078_v4 }
 0x25c   :  { %4079 = vrcp.f32 %v2506_v6  ;;  %v2272_v8 = vpop.f32.mrf.mxu2 }
 0x25d   :  { %v2273_v9 = vadd.f32 %v2272_v8, %v2260_v7 }
 0x25f   :  { %v2486_v10 = vsub.f32 0.0, %v2273_v9 }
 0x261   :  { %v2495_v11 = vmul.f32 1.442695, %v2486_v10 }
 0x262   :  { %v4080_v19 = vpop.eup %4079 }
 0x263   :  { %2520 = vst [vmem:[%s6068_s7 + $0x8] sm:$0xff] %v4080_v19  ;;  %4081 = vpow2.f32 %v2495_v11 }
 0x264   :  { %v2274_v14 = vpop.f32.mrf.mxu2 }
 0x266   :  { %v2285_v12 = vpop.f32.mrf.mxu3  ;;  %v2298_v13 = vpop.f32.mrf.mxu0 }
 0x267   :  { %v2299_v26 = vadd.f32 %v2298_v13, %v2285_v12 }
 0x269   :  { %v4082_v15 = vpop.eup %4081 }
 0x26a   :  { %v2507_v16 = vadd.f32 1.0, %v4082_v15 }
 0x26c   :  { %4083 = vrcp.f32 %v2507_v16 }
 0x26e   :  { %v2287_v17 = vpop.f32.mrf.mxu3  ;;  %v2300_v20 = vpop.f32.mrf.mxu0 }
 0x270   :  { %v2311_v23 = vpop.f32.mrf.mxu1 }
 0x271   :  { %v2312_v27 = vadd.f32 %v2311_v23, %v2299_v26 }
 0x272   :  { %v4084_v24 = vpop.eup %4083 }
 0x273   :  { %2521 = vst [vmem:[%s6068_s7 + $0x10] sm:$0xff] %v4084_v24 }
 0x278   :  { %v2313_v25 = vpop.f32.mrf.mxu1 }
 0x27c   :  { %v2324_v28 = vpop.f32.mrf.mxu2 }
 0x27d   :  { %v2325_v29 = vadd.f32 %v2324_v28, %v2312_v27 }
 0x27f   :  { %v2487_v30 = vsub.f32 0.0, %v2325_v29 }
 0x281   :  { %v2497_v31 = vmul.f32 1.442695, %v2487_v30 }
 0x283   :  { %4085 = vpow2.f32 %v2497_v31 }
 0x284   :  { %v2326_v22 = vpop.f32.mrf.mxu2 }
 0x286   :  { %v2337_v21 = vpop.f32.mrf.mxu3  ;;  %v2350_v18 = vpop.f32.mrf.mxu0 }
 0x287   :  { %v2351_v40 = vadd.f32 %v2350_v18, %v2337_v21 }
 0x289   :  { %v4086_v32 = vpop.eup %4085 }
 0x28a   :  { %v2508_v34 = vadd.f32 1.0, %v4086_v32 }
 0x28c   :  { %4087 = vrcp.f32 %v2508_v34 }
 0x28e   :  { %v2339_v35 = vpop.f32.mrf.mxu3  ;;  %v2352_v36 = vpop.f32.mrf.mxu0 }
 0x290   :  { %v2363_v37 = vpop.f32.mrf.mxu1 }
 0x291   :  { %v2364_v41 = vadd.f32 %v2363_v37, %v2351_v40 }
 0x292   :  { %v4088_v38 = vpop.eup %4087 }
 0x293   :  { %2522 = vst [vmem:[%s6068_s7 + $0x18] sm:$0xff] %v4088_v38 }
 0x298   :  { %v2365_v39 = vpop.f32.mrf.mxu1 }
 0x29c   :  { %v2376_v42 = vpop.f32.mrf.mxu2 }
 0x29d   :  { %v2377_v43 = vadd.f32 %v2376_v42, %v2364_v41 }
 0x29f   :  { %v2488_v33 = vsub.f32 0.0, %v2377_v43 }
 0x2a1   :  { %v2499_v44 = vmul.f32 1.442695, %v2488_v33 }
 0x2a3   :  { %4089 = vpow2.f32 %v2499_v44 }
 0x2a4   :  { %v2378_v47 = vpop.f32.mrf.mxu2 }
 0x2a6   :  { %v2389_v45 = vpop.f32.mrf.mxu3  ;;  %v2402_v46 = vpop.f32.mrf.mxu0 }
 0x2a7   :  { %v2403_v55 = vadd.f32 %v2402_v46, %v2389_v45 }
 0x2a9   :  { %v4090_v48 = vpop.eup %4089 }
 0x2aa   :  { %v2509_v49 = vadd.f32 1.0, %v4090_v48 }
 0x2ac   :  { %4091 = vrcp.f32 %v2509_v49 }
 0x2ae   :  { %v2391_v50 = vpop.f32.mrf.mxu3  ;;  %v2404_v51 = vpop.f32.mrf.mxu0 }
 0x2b0   :  { %v2415_v52 = vpop.f32.mrf.mxu1 }
 0x2b1   :  { %v2416_v56 = vadd.f32 %v2415_v52, %v2403_v55 }
 0x2b2   :  { %v4092_v53 = vpop.eup %4091 }
 0x2b3   :  { %2523 = vst [vmem:[%s6068_s7 + $0x20] sm:$0xff] %v4092_v53 }
 0x2b8   :  { %v2417_v54 = vpop.f32.mrf.mxu1 }
 0x2bc   :  { %v2428_v57 = vpop.f32.mrf.mxu2 }
 0x2bd   :  { %v2429_v58 = vadd.f32 %v2428_v57, %v2416_v56 }
 0x2bf   :  { %v2489_v60 = vsub.f32 0.0, %v2429_v58 }
 0x2c1   :  { %v2501_v61 = vmul.f32 1.442695, %v2489_v60 }
 0x2c3   :  { %4093 = vpow2.f32 %v2501_v61 }
 0x2c4   :  { %v2430_v0 = vpop.f32.mrf.mxu2 }
 0x2c6   :  { %v2454_v62 = vpop.f32.mrf.mxu0  ;;  %v2441_v63 = vpop.f32.mrf.mxu3 }
 0x2c7   :  { %v2455_v6 = vadd.f32 %v2454_v62, %v2441_v63 }
 0x2c9   :  { %v4094_v1 = vpop.eup %4093 }
 0x2ca   :  { %v2510_v2 = vadd.f32 1.0, %v4094_v1 }
 0x2cc   :  { %4095 = vrcp.f32 %v2510_v2 }
 0x2ce   :  { %v2456_v3 = vpop.f32.mrf.mxu0  ;;  %v2443_v59 = vpop.f32.mrf.mxu3 }
 0x2d0   :  { %v2467_v4 = vpop.f32.mrf.mxu1 }
 0x2d1   :  { %v2468_v8 = vadd.f32 %v2467_v4, %v2455_v6 }
 0x2d2   :  { %v4096_v5 = vpop.eup %4095 }
 0x2d3   :  { %2524 = vst [vmem:[%s6068_s7 + $0x28] sm:$0xff] %v4096_v5 }
 0x2d8   :  { %v2469_v7 = vpop.f32.mrf.mxu1 }
 0x2dc   :  { %v2480_v9 = vpop.f32.mrf.mxu2 }
 0x2dd   :  { %v2481_v10 = vadd.f32 %v2480_v9, %v2468_v8 }
 0x2df   :  { %v2490_v19 = vsub.f32 0.0, %v2481_v10 }
 0x2e1   :  { %v2503_v11 = vmul.f32 1.442695, %v2490_v19 }
 0x2e3   :  { %4097 = vpow2.f32 %v2503_v11 }
 0x2e4   :  { %v2482_v12 = vpop.f32.mrf.mxu2 }
 0x2e9   :  { %v4098_v13 = vpop.eup %4097 }
 0x2ea   :  { %v2511_v14 = vadd.f32 1.0, %v4098_v13 }
 0x2ec   :  { %4099 = vrcp.f32 %v2511_v14 }
 0x2f2   :  { %v4100_v15 = vpop.eup %4099 }
 0x2f3   :  { %2526 = vst.msk [vmem:[%s6068_s7 + $0x30] sm:$0xff] %vm2525_vm1, %v4100_v15 }

</bundles_post_ra>
